<compile_context>
chip_gen: v7x
topology: tpu7x:2x2x1
jax: 0.10.0
libtpu: 0.0.40
codegen_flags: <defaults>
</compile_context>

<pallas_src>
import functools

import numpy as np

import jax
import jax.numpy as jnp
from jax import lax
from jax.experimental import pallas as pl
from jax.experimental.pallas import tpu as pltpu


# ----------------------------------------------------------------------------
# im2col patch builder for a 3x3 / pad=1 conv on lane-flattened activations.
# ----------------------------------------------------------------------------
def _build_patch(imgs, W, L, left_ok, right_ok):
    """imgs: list of Nb per-image (Cin, L) f32 activations (L = H*W).

    Returns the (9*Cin, Nb*L) im2col patch with rows ordered (dx, dy, cin) and
    lanes ordered (image, y, x).  The flat strip [0s | img | 0s] handles the
    vertical 1-pixel border; the horizontal border is handled by zeroing the
    invalid edge columns of the dx=0 / dx=2 tap groups (one jnp.where each).
    """
    cin = imgs[0].shape[0]
    zpad = jnp.zeros((cin, W + 1), jnp.float32)
    bufs = [jnp.concatenate([zpad, im, zpad], axis=1) for im in imgs]   # (cin, L+2W+2)
    groups = []
    for dx in range(3):
        dy_rows = []
        for dy in range(3):
            s = dy * W + dx
            dy_rows.append(jnp.concatenate([b[:, s:s + L] for b in bufs], axis=1))
        rows = jnp.concatenate(dy_rows, axis=0)                         # (3*cin, Nb*L)
        if dx == 0:
            rows = jnp.where(left_ok, rows, 0.0)    # tap x-1 invalid at x == 0
        elif dx == 2:
            rows = jnp.where(right_ok, rows, 0.0)   # tap x+1 invalid at x == W-1
        groups.append(rows)
    return jnp.concatenate(groups, axis=0)                              # (9*cin, Nb*L)


# ----------------------------------------------------------------------------
# Fused kernel: one batch-block (Nb images) per grid step.
# ----------------------------------------------------------------------------
def _unet_up_kernel(x1_ref, x2_ref, awt_ref, w1_ref, b1_ref, w2_ref, b2_ref,
                    o_ref, *, W, C2, h_taps):
    # x1_ref : (Nb, C1, L)       inputs1, spatial lane-flattened (L = H*W)
    # x2_ref : (Nb*Hi*C2, Wi)    inputs2, rows ordered (n, hi, c), lanes = wi
    # awt_ref: (Wi, W)           width-axis bilinear matrix A_w^T
    # w*_ref : (Cout, 9*Cin)     im2col weights, (dx, dy, cin) column order
    # b*_ref : (Cout, 1)
    # o_ref  : (Nb, Cout, L)
    Nb, _, L = x1_ref.shape
    H = len(h_taps)
    Hi = H // 2
    NbL = Nb * L

    # x-coordinate of every flattened position -> horizontal edge masks
    # (valid for the whole batch block because L is a multiple of W).
    col = lax.broadcasted_iota(jnp.int32, (1, NbL), 1) % W
    left_ok = col >= 1
    right_ok = col <= W - 2

    # ---- separable bilinear 2x upsample (align_corners=True) ---------------
    # Width axis: one small MXU matmul over every (image, source-row, channel).
    tw = jnp.dot(x2_ref[...].astype(jnp.float32), awt_ref[...],
                 preferred_element_type=jnp.float32)          # (Nb*Hi*C2, W)

    imgs = []
    for n in range(Nb):
        base = n * Hi * C2
        # Height axis: every output row is a 2-tap blend of source rows with
        # compile-time weights (sparse form of the (H, Hi) interp matmul).
        # Assembling the H row-slabs along lanes yields the flat (C2, L) image.
        slabs = []
        for (k0, k1, f) in h_taps:
            r0 = tw[base + k0 * C2: base + (k0 + 1) * C2, :]            # (C2, W)
            if f == 0.0:
                slabs.append(r0)
            else:
                r1 = tw[base + k1 * C2: base + (k1 + 1) * C2, :]
                slabs.append(r0 * (1.0 - f) + r1 * f)
        up_n = jnp.concatenate(slabs, axis=1)                           # (C2, L)
        # Channel concat with inputs1 -- entirely in VMEM, no HBM round trip.
        imgs.append(jnp.concatenate(
            [x1_ref[n].astype(jnp.float32), up_n], axis=0))             # (Cin, L)

    # ---- conv1 (3x3, pad 1) + ReLU : one MXU matmul for the whole block ----
    # TODO(synk): if profiling shows MXU push latency dominating at tiny Cout,
    # run this matmul in the transposed orientation (patch.T @ w1.T).
    patch1 = _build_patch(imgs, W, L, left_ok, right_ok)                # (9Cin, NbL)
    h1 = jnp.dot(w1_ref[...], patch1, preferred_element_type=jnp.float32)
    h1 = jnp.maximum(h1 + b1_ref[...], 0.0)                             # (Cout, NbL)

    # ---- conv2 (3x3, pad 1) + ReLU ------------------------------------------
    imgs2 = [h1[:, n * L:(n + 1) * L] for n in range(Nb)]
    patch2 = _build_patch(imgs2, W, L, left_ok, right_ok)               # (9Cout, NbL)
    y = jnp.dot(w2_ref[...], patch2, preferred_element_type=jnp.float32)
    y = jnp.maximum(y + b2_ref[...], 0.0)                               # (Cout, NbL)

    # ---- lane-dense stores, one (Cout, L) slab per image --------------------
    for n in range(Nb):
        o_ref[n] = y[:, n * L:(n + 1) * L].astype(o_ref.dtype)


# ----------------------------------------------------------------------------
# Host-side constants / parameter preparation.
# ----------------------------------------------------------------------------
def _bilinear_matrix_np(n_in, n_out):
    """(n_out, n_in) 1-D bilinear interpolation matrix, align_corners=True."""
    src = np.linspace(0.0, n_in - 1.0, n_out)
    i0 = np.floor(src).astype(np.int64)
    i1 = np.minimum(i0 + 1, n_in - 1)
    f = src - i0
    m = np.zeros((n_out, n_in), np.float32)
    m[np.arange(n_out), i0] += (1.0 - f).astype(np.float32)
    m[np.arange(n_out), i1] += f.astype(np.float32)
    return m


def prepare_unet_up_params(w1_hwio, b1, w2_hwio, b2):
    """One-time repack of conv weights into im2col (dx, dy, cin) matrices.

    Hoisted out of the per-forward path so the transposes/reshapes are not
    re-emitted as XLA ops on every call.
    """
    cin, cout = int(w1_hwio.shape[2]), int(w1_hwio.shape[3])
    w1_mat = jnp.transpose(w1_hwio.astype(jnp.float32), (3, 1, 0, 2)).reshape(cout, 9 * cin)
    w2_mat = jnp.transpose(w2_hwio.astype(jnp.float32), (3, 1, 0, 2)).reshape(cout, 9 * cout)
    return (w1_mat, jnp.asarray(b1, jnp.float32).reshape(cout, 1),
            w2_mat, jnp.asarray(b2, jnp.float32).reshape(cout, 1))


# ----------------------------------------------------------------------------
# Wrapper: NCHW in / NCHW out, matching the PyTorch module.
# ----------------------------------------------------------------------------
@jax.jit
def unet_up(inputs1, inputs2, w1_mat, b1_col, w2_mat, b2_col):
    N, C1, H, W = inputs1.shape
    N2, C2, Hi, Wi = inputs2.shape
    assert N2 == N and H == 2 * Hi and W == 2 * Wi
    Cin = C1 + C2
    Cout = w1_mat.shape[0]
    L = H * W

    # Trace-time constants (baked into the executable, never recomputed).
    awt = jnp.asarray(_bilinear_matrix_np(Wi, W).T)            # (Wi, W)
    src_h = np.linspace(0.0, Hi - 1.0, H)
    k0 = np.floor(src_h).astype(np.int64)
    k1 = np.minimum(k0 + 1, Hi - 1)
    h_taps = tuple((int(k0[i]), int(k1[i]), float(src_h[i] - k0[i])) for i in range(H))

    # Layout-only reshapes, plus a tiny transpose of inputs2 so the in-kernel
    # height blend uses contiguous row slices (rows ordered (n, hi, c)).
    x1f = inputs1.reshape(N, C1, L)
    x2p = jnp.transpose(inputs2, (0, 2, 1, 3)).reshape(N * Hi * C2, Wi)

    # ---- per-generation VMEM budget and batch-block size --------------------
    try:
        vmem_cap = int(pltpu.get_tpu_info().vmem_capacity_bytes)
    except Exception:                       # be conservative (v7x-safe default)
        vmem_cap = 64 * 1024 * 1024
    budget = min(int(0.75 * vmem_cap), 100 * 1024 * 1024)

    def footprint(nb):
        """Explicit f32-byte count of one grid step processing nb images."""
        io = 2 * 4 * nb * (C1 * L + Hi * C2 * Wi + Cout * L)    # 2x: pipelined blocks
        const = 2 * 4 * (Wi * W + 9 * Cin * Cout + 9 * Cout * Cout + 2 * Cout)
        inter = 4 * nb * (Hi * C2 * W + 2 * C2 * L + Cin * (L + 2 * W + 2)
                          + 9 * Cin * L + Cout * L + Cout * (L + 2 * W + 2)
                          + 9 * Cout * L + Cout * L + 2 * L)    # 1x: in-kernel temps
        return io + const + inter

    nb = 1
    for cand in range(N, 0, -1):            # largest divisor of N that fits
        if N % cand == 0 and footprint(cand) <= budget:
            nb = cand
            break
    vmem_limit = int(min(budget, max(8 << 20, int(1.5 * footprint(nb)))))

    # TODO(synk): for production decoder stages where even footprint(1) exceeds
    # the budget, add spatial row-tiling with a 1-row halo (grid=(N//nb, H//th))
    # so both v7x TensorCores stay busy even at small N.
    kernel = functools.partial(_unet_up_kernel, W=W, C2=C2, h_taps=h_taps)
    out_flat = pl.pallas_call(
        kernel,
        out_shape=jax.ShapeDtypeStruct((N, Cout, L), inputs1.dtype),
        grid=(N // nb,),
        in_specs=[
            pl.BlockSpec((nb, C1, L), lambda b: (b, 0, 0)),
            pl.BlockSpec((nb * Hi * C2, Wi), lambda b: (b, 0)),
            # Grid-invariant operands: only a few KB total now that the kron
            # matrix is gone; use pipeline_mode=pl.Buffered(1) if they grow.
            pl.BlockSpec((Wi, W), lambda b: (0, 0)),
            pl.BlockSpec((Cout, 9 * Cin), lambda b: (0, 0)),
            pl.BlockSpec((Cout, 1), lambda b: (0, 0)),
            pl.BlockSpec((Cout, 9 * Cout), lambda b: (0, 0)),
            pl.BlockSpec((Cout, 1), lambda b: (0, 0)),
        ],
        out_specs=pl.BlockSpec((nb, Cout, L), lambda b: (b, 0, 0)),
        compiler_params=pltpu.CompilerParams(
            dimension_semantics=("parallel",),
            vmem_limit_bytes=vmem_limit),
    )(x1f, x2p, awt, w1_mat, b1_col, w2_mat, b2_col)

    return out_flat.reshape(N, Cout, H, W)


# ----------------------------------------------------------------------------
# Pure-JAX reference (gather-based upsample + lax.conv) for correctness check.
# ----------------------------------------------------------------------------
def _upsample_bilinear_2x_ref(x_nchw):
    N, C, H, W = x_nchw.shape
    Ho, Wo = 2 * H, 2 * W
    ys = jnp.linspace(0.0, H - 1.0, Ho)
    xs = jnp.linspace(0.0, W - 1.0, Wo)
    y0 = jnp.floor(ys).astype(jnp.int32)
    y1 = jnp.minimum(y0 + 1, H - 1)
    wy = (ys - y0.astype(ys.dtype))[None, None, :, None]
    x0 = jnp.floor(xs).astype(jnp.int32)
    x1 = jnp.minimum(x0 + 1, W - 1)
    wx = (xs - x0.astype(xs.dtype))[None, None, None, :]
    rows = x_nchw[:, :, y0, :] * (1.0 - wy) + x_nchw[:, :, y1, :] * wy
    return rows[:, :, :, x0] * (1.0 - wx) + rows[:, :, :, x1] * wx


def _ref_unet_up(inputs1, inputs2, w1, b1, w2, b2):
    up2 = _upsample_bilinear_2x_ref(inputs2)
    x = jnp.concatenate([inputs1, up2], axis=1)
    x = jnp.transpose(x, (0, 2, 3, 1))
    dn = lax.conv_dimension_numbers(x.shape, w1.shape, ("NHWC", "HWIO", "NHWC"))
    x = lax.conv_general_dilated(x, w1, (1, 1), "SAME", dimension_numbers=dn)
    x = jnp.maximum(x + b1[None, None, None, :], 0.0)
    x = lax.conv_general_dilated(x, w2, (1, 1), "SAME", dimension_numbers=dn)
    x = jnp.maximum(x + b2[None, None, None, :], 0.0)
    return jnp.transpose(x, (0, 3, 1, 2))


if __name__ == "__main__":
    # Small shapes: inputs1 (N, C1, H, W); inputs2 (N, C2, H/2, W/2)
    N, C1, C2, H, W = 2, 4, 4, 16, 16
    in_size = C1 + C2        # channels after concat = 8
    out_size = 4

    key = jax.random.PRNGKey(0)
    k1, k2, k3, k4, k5, k6 = jax.random.split(key, 6)

    inputs1 = jax.random.normal(k1, (N, C1, H, W), dtype=jnp.float32)
    inputs2 = jax.random.normal(k2, (N, C2, H // 2, W // 2), dtype=jnp.float32)

    # Deterministic parameter init (HWIO layout), PyTorch-like uniform bounds.
    bound1 = float(1.0 / np.sqrt(in_size * 9))
    bound2 = float(1.0 / np.sqrt(out_size * 9))
    w1 = jax.random.uniform(k3, (3, 3, in_size, out_size), jnp.float32,
                            -bound1, bound1)
    b1 = jax.random.uniform(k4, (out_size,), jnp.float32, -bound1, bound1)
    w2 = jax.random.uniform(k5, (3, 3, out_size, out_size), jnp.float32,
                            -bound2, bound2)
    b2 = jax.random.uniform(k6, (out_size,), jnp.float32, -bound2, bound2)

    # One-time weight repacking, kept out of the per-call hot path.
    params = jax.block_until_ready(prepare_unet_up_params(w1, b1, w2, b2))

    out = unet_up(inputs1, inputs2, *params)
    out = jax.block_until_ready(out)

    ref = _ref_unet_up(inputs1, inputs2, w1, b1, w2, b2)
    assert out.shape == (N, out_size, H, W), out.shape
    max_err = float(jnp.max(jnp.abs(out - ref)))
    assert jnp.allclose(out, ref, atol=1e-4, rtol=1e-4), max_err

    print("KERNEL_OK")
</pallas_src>

<mosaic_0001>
module attributes {stable_mosaic.version = 11 : i64} {
  func.func @_unet_up_kernel(%arg0: i32, %arg1: memref<2x4x256xf32, #tpu.memory_space<vmem>>, %arg2: memref<64x8xf32, #tpu.memory_space<vmem>>, %arg3: memref<8x16xf32, #tpu.memory_space<vmem>>, %arg4: memref<4x72xf32, #tpu.memory_space<vmem>>, %arg5: memref<4x1xf32, #tpu.memory_space<vmem>>, %arg6: memref<4x36xf32, #tpu.memory_space<vmem>>, %arg7: memref<4x1xf32, #tpu.memory_space<vmem>>, %arg8: memref<2x4x256xf32, #tpu.memory_space<vmem>>) attributes {dimension_semantics = [#tpu.dimension_semantics<parallel>], iteration_bounds = array<i64: 1>, scalar_prefetch = 0 : i64, scratch_operands = 0 : i64, tpu.core_type = #tpu.core_type<tc>, window_params = [{transform_indices = @transform_0, window_bounds = array<i64: 2, 4, 256>}, {transform_indices = @transform_1, window_bounds = array<i64: 64, 8>}, {pipeline_mode = #tpu.pipeline_mode<synchronous>, transform_indices = @transform_2, window_bounds = array<i64: 8, 16>}, {pipeline_mode = #tpu.pipeline_mode<synchronous>, transform_indices = @transform_3, window_bounds = array<i64: 4, 72>}, {pipeline_mode = #tpu.pipeline_mode<synchronous>, transform_indices = @transform_4, window_bounds = array<i64: 4, 1>}, {pipeline_mode = #tpu.pipeline_mode<synchronous>, transform_indices = @transform_5, window_bounds = array<i64: 4, 36>}, {pipeline_mode = #tpu.pipeline_mode<synchronous>, transform_indices = @transform_6, window_bounds = array<i64: 4, 1>}, {transform_indices = @transform_7, window_bounds = array<i64: 2, 4, 256>}]} {
    %0 = tpu.iota {dimensions = array<i32: 1>} : vector<1x512xi32>
    %c16_i32 = arith.constant 16 : i32
    %c0_i32 = arith.constant 0 : i32
    %1 = arith.cmpi eq, %c16_i32, %c0_i32 : i32
    %c1_i32 = arith.constant 1 : i32
    %2 = arith.select %1, %c1_i32, %c16_i32 : i32
    %3 = vector.broadcast %2 : i32 to vector<1x512xi32>
    %4 = arith.remsi %0, %3 : vector<1x512xi32>
    %c0_i32_0 = arith.constant 0 : i32
    %5 = vector.broadcast %c0_i32_0 : i32 to vector<1x512xi32>
    %6 = arith.cmpi ne, %4, %5 : vector<1x512xi32>
    %c0_i32_1 = arith.constant 0 : i32
    %7 = vector.broadcast %c0_i32_1 : i32 to vector<1x512xi32>
    %8 = arith.cmpi slt, %4, %7 : vector<1x512xi32>
    %c0_i32_2 = arith.constant 0 : i32
    %9 = arith.cmpi slt, %2, %c0_i32_2 : i32
    %10 = vector.broadcast %9 : i1 to vector<1x512xi1>
    %11 = vector.broadcast %10 : vector<1x512xi1> to vector<1x512xi1>
    %12 = arith.xori %8, %11 : vector<1x512xi1>
    %13 = arith.andi %12, %6 : vector<1x512xi1>
    %14 = vector.broadcast %2 : i32 to vector<1x512xi32>
    %15 = arith.addi %4, %14 : vector<1x512xi32>
    %16 = arith.select %13, %15, %4 : vector<1x512xi1>, vector<1x512xi32>
    %c1_i32_3 = arith.constant 1 : i32
    %17 = vector.broadcast %c1_i32_3 : i32 to vector<1x512xi32>
    %18 = arith.cmpi sge, %16, %17 : vector<1x512xi32>
    %c14_i32 = arith.constant 14 : i32
    %19 = vector.broadcast %c14_i32 : i32 to vector<1x512xi32>
    %20 = arith.cmpi sle, %16, %19 : vector<1x512xi32>
    %c0 = arith.constant 0 : index
    %c0_4 = arith.constant 0 : index
    %21 = vector.load %arg2[%c0, %c0_4] : memref<64x8xf32, #tpu.memory_space<vmem>>, vector<64x8xf32>
    %c0_5 = arith.constant 0 : index
    %c0_6 = arith.constant 0 : index
    %22 = vector.load %arg3[%c0_5, %c0_6] : memref<8x16xf32, #tpu.memory_space<vmem>>, vector<8x16xf32>
    %cst = arith.constant dense<0.000000e+00> : vector<64x16xf32>
    %23 = tpu.matmul %21, %22, %cst {dimension_numbers = #tpu.dot_dimension_numbers<[1], [0], [0], [1], [0, 0, 1, 1], [], []>} : vector<64x8xf32>, vector<8x16xf32>, vector<64x16xf32> -> vector<64x16xf32>
    %24 = vector.extract_strided_slice %23 {offsets = [0, 0], sizes = [4, 16], strides = [1, 1]} : vector<64x16xf32> to vector<4x16xf32>
    %25 = vector.extract_strided_slice %23 {offsets = [0, 0], sizes = [4, 16], strides = [1, 1]} : vector<64x16xf32> to vector<4x16xf32>
    %26 = vector.extract_strided_slice %23 {offsets = [4, 0], sizes = [4, 16], strides = [1, 1]} : vector<64x16xf32> to vector<4x16xf32>
    %cst_7 = arith.constant 0.533333361 : f32
    %27 = vector.broadcast %cst_7 : f32 to vector<4x16xf32>
    %28 = arith.mulf %25, %27 : vector<4x16xf32>
    %cst_8 = arith.constant 0.466666669 : f32
    %29 = vector.broadcast %cst_8 : f32 to vector<4x16xf32>
    %30 = arith.mulf %26, %29 : vector<4x16xf32>
    %31 = arith.addf %28, %30 : vector<4x16xf32>
    %32 = vector.extract_strided_slice %23 {offsets = [0, 0], sizes = [4, 16], strides = [1, 1]} : vector<64x16xf32> to vector<4x16xf32>
    %33 = vector.extract_strided_slice %23 {offsets = [4, 0], sizes = [4, 16], strides = [1, 1]} : vector<64x16xf32> to vector<4x16xf32>
    %cst_9 = arith.constant 0.0666666701 : f32
    %34 = vector.broadcast %cst_9 : f32 to vector<4x16xf32>
    %35 = arith.mulf %32, %34 : vector<4x16xf32>
    %cst_10 = arith.constant 0.933333337 : f32
    %36 = vector.broadcast %cst_10 : f32 to vector<4x16xf32>
    %37 = arith.mulf %33, %36 : vector<4x16xf32>
    %38 = arith.addf %35, %37 : vector<4x16xf32>
    %39 = vector.extract_strided_slice %23 {offsets = [4, 0], sizes = [4, 16], strides = [1, 1]} : vector<64x16xf32> to vector<4x16xf32>
    %40 = vector.extract_strided_slice %23 {offsets = [8, 0], sizes = [4, 16], strides = [1, 1]} : vector<64x16xf32> to vector<4x16xf32>
    %cst_11 = arith.constant 6.000000e-01 : f32
    %41 = vector.broadcast %cst_11 : f32 to vector<4x16xf32>
    %42 = arith.mulf %39, %41 : vector<4x16xf32>
    %cst_12 = arith.constant 4.000000e-01 : f32
    %43 = vector.broadcast %cst_12 : f32 to vector<4x16xf32>
    %44 = arith.mulf %40, %43 : vector<4x16xf32>
    %45 = arith.addf %42, %44 : vector<4x16xf32>
    %46 = vector.extract_strided_slice %23 {offsets = [4, 0], sizes = [4, 16], strides = [1, 1]} : vector<64x16xf32> to vector<4x16xf32>
    %47 = vector.extract_strided_slice %23 {offsets = [8, 0], sizes = [4, 16], strides = [1, 1]} : vector<64x16xf32> to vector<4x16xf32>
    %cst_13 = arith.constant 0.13333334 : f32
    %48 = vector.broadcast %cst_13 : f32 to vector<4x16xf32>
    %49 = arith.mulf %46, %48 : vector<4x16xf32>
    %cst_14 = arith.constant 0.866666674 : f32
    %50 = vector.broadcast %cst_14 : f32 to vector<4x16xf32>
    %51 = arith.mulf %47, %50 : vector<4x16xf32>
    %52 = arith.addf %49, %51 : vector<4x16xf32>
    %53 = vector.extract_strided_slice %23 {offsets = [8, 0], sizes = [4, 16], strides = [1, 1]} : vector<64x16xf32> to vector<4x16xf32>
    %54 = vector.extract_strided_slice %23 {offsets = [12, 0], sizes = [4, 16], strides = [1, 1]} : vector<64x16xf32> to vector<4x16xf32>
    %cst_15 = arith.constant 0.666666686 : f32
    %55 = vector.broadcast %cst_15 : f32 to vector<4x16xf32>
    %56 = arith.mulf %53, %55 : vector<4x16xf32>
    %cst_16 = arith.constant 0.333333343 : f32
    %57 = vector.broadcast %cst_16 : f32 to vector<4x16xf32>
    %58 = arith.mulf %54, %57 : vector<4x16xf32>
    %59 = arith.addf %56, %58 : vector<4x16xf32>
    %60 = vector.extract_strided_slice %23 {offsets = [8, 0], sizes = [4, 16], strides = [1, 1]} : vector<64x16xf32> to vector<4x16xf32>
    %61 = vector.extract_strided_slice %23 {offsets = [12, 0], sizes = [4, 16], strides = [1, 1]} : vector<64x16xf32> to vector<4x16xf32>
    %cst_17 = arith.constant 2.000000e-01 : f32
    %62 = vector.broadcast %cst_17 : f32 to vector<4x16xf32>
    %63 = arith.mulf %60, %62 : vector<4x16xf32>
    %cst_18 = arith.constant 8.000000e-01 : f32
    %64 = vector.broadcast %cst_18 : f32 to vector<4x16xf32>
    %65 = arith.mulf %61, %64 : vector<4x16xf32>
    %66 = arith.addf %63, %65 : vector<4x16xf32>
    %67 = vector.extract_strided_slice %23 {offsets = [12, 0], sizes = [4, 16], strides = [1, 1]} : vector<64x16xf32> to vector<4x16xf32>
    %68 = vector.extract_strided_slice %23 {offsets = [16, 0], sizes = [4, 16], strides = [1, 1]} : vector<64x16xf32> to vector<4x16xf32>
    %cst_19 = arith.constant 0.733333349 : f32
    %69 = vector.broadcast %cst_19 : f32 to vector<4x16xf32>
    %70 = arith.mulf %67, %69 : vector<4x16xf32>
    %cst_20 = arith.constant 0.266666681 : f32
    %71 = vector.broadcast %cst_20 : f32 to vector<4x16xf32>
    %72 = arith.mulf %68, %71 : vector<4x16xf32>
    %73 = arith.addf %70, %72 : vector<4x16xf32>
    %74 = vector.extract_strided_slice %23 {offsets = [12, 0], sizes = [4, 16], strides = [1, 1]} : vector<64x16xf32> to vector<4x16xf32>
    %75 = vector.extract_strided_slice %23 {offsets = [16, 0], sizes = [4, 16], strides = [1, 1]} : vector<64x16xf32> to vector<4x16xf32>
    %cst_21 = arith.constant 0.266666681 : f32
    %76 = vector.broadcast %cst_21 : f32 to vector<4x16xf32>
    %77 = arith.mulf %74, %76 : vector<4x16xf32>
    %cst_22 = arith.constant 0.733333349 : f32
    %78 = vector.broadcast %cst_22 : f32 to vector<4x16xf32>
    %79 = arith.mulf %75, %78 : vector<4x16xf32>
    %80 = arith.addf %77, %79 : vector<4x16xf32>
    %81 = vector.extract_strided_slice %23 {offsets = [16, 0], sizes = [4, 16], strides = [1, 1]} : vector<64x16xf32> to vector<4x16xf32>
    %82 = vector.extract_strided_slice %23 {offsets = [20, 0], sizes = [4, 16], strides = [1, 1]} : vector<64x16xf32> to vector<4x16xf32>
    %cst_23 = arith.constant 8.000000e-01 : f32
    %83 = vector.broadcast %cst_23 : f32 to vector<4x16xf32>
    %84 = arith.mulf %81, %83 : vector<4x16xf32>
    %cst_24 = arith.constant 2.000000e-01 : f32
    %85 = vector.broadcast %cst_24 : f32 to vector<4x16xf32>
    %86 = arith.mulf %82, %85 : vector<4x16xf32>
    %87 = arith.addf %84, %86 : vector<4x16xf32>
    %88 = vector.extract_strided_slice %23 {offsets = [16, 0], sizes = [4, 16], strides = [1, 1]} : vector<64x16xf32> to vector<4x16xf32>
    %89 = vector.extract_strided_slice %23 {offsets = [20, 0], sizes = [4, 16], strides = [1, 1]} : vector<64x16xf32> to vector<4x16xf32>
    %cst_25 = arith.constant 0.333333343 : f32
    %90 = vector.broadcast %cst_25 : f32 to vector<4x16xf32>
    %91 = arith.mulf %88, %90 : vector<4x16xf32>
    %cst_26 = arith.constant 0.666666686 : f32
    %92 = vector.broadcast %cst_26 : f32 to vector<4x16xf32>
    %93 = arith.mulf %89, %92 : vector<4x16xf32>
    %94 = arith.addf %91, %93 : vector<4x16xf32>
    %95 = vector.extract_strided_slice %23 {offsets = [20, 0], sizes = [4, 16], strides = [1, 1]} : vector<64x16xf32> to vector<4x16xf32>
    %96 = vector.extract_strided_slice %23 {offsets = [24, 0], sizes = [4, 16], strides = [1, 1]} : vector<64x16xf32> to vector<4x16xf32>
    %cst_27 = arith.constant 0.866666674 : f32
    %97 = vector.broadcast %cst_27 : f32 to vector<4x16xf32>
    %98 = arith.mulf %95, %97 : vector<4x16xf32>
    %cst_28 = arith.constant 0.13333334 : f32
    %99 = vector.broadcast %cst_28 : f32 to vector<4x16xf32>
    %100 = arith.mulf %96, %99 : vector<4x16xf32>
    %101 = arith.addf %98, %100 : vector<4x16xf32>
    %102 = vector.extract_strided_slice %23 {offsets = [20, 0], sizes = [4, 16], strides = [1, 1]} : vector<64x16xf32> to vector<4x16xf32>
    %103 = vector.extract_strided_slice %23 {offsets = [24, 0], sizes = [4, 16], strides = [1, 1]} : vector<64x16xf32> to vector<4x16xf32>
    %cst_29 = arith.constant 4.000000e-01 : f32
    %104 = vector.broadcast %cst_29 : f32 to vector<4x16xf32>
    %105 = arith.mulf %102, %104 : vector<4x16xf32>
    %cst_30 = arith.constant 6.000000e-01 : f32
    %106 = vector.broadcast %cst_30 : f32 to vector<4x16xf32>
    %107 = arith.mulf %103, %106 : vector<4x16xf32>
    %108 = arith.addf %105, %107 : vector<4x16xf32>
    %109 = vector.extract_strided_slice %23 {offsets = [24, 0], sizes = [4, 16], strides = [1, 1]} : vector<64x16xf32> to vector<4x16xf32>
    %110 = vector.extract_strided_slice %23 {offsets = [28, 0], sizes = [4, 16], strides = [1, 1]} : vector<64x16xf32> to vector<4x16xf32>
    %cst_31 = arith.constant 0.933333337 : f32
    %111 = vector.broadcast %cst_31 : f32 to vector<4x16xf32>
    %112 = arith.mulf %109, %111 : vector<4x16xf32>
    %cst_32 = arith.constant 0.0666666701 : f32
    %113 = vector.broadcast %cst_32 : f32 to vector<4x16xf32>
    %114 = arith.mulf %110, %113 : vector<4x16xf32>
    %115 = arith.addf %112, %114 : vector<4x16xf32>
    %116 = vector.extract_strided_slice %23 {offsets = [24, 0], sizes = [4, 16], strides = [1, 1]} : vector<64x16xf32> to vector<4x16xf32>
    %117 = vector.extract_strided_slice %23 {offsets = [28, 0], sizes = [4, 16], strides = [1, 1]} : vector<64x16xf32> to vector<4x16xf32>
    %cst_33 = arith.constant 0.466666669 : f32
    %118 = vector.broadcast %cst_33 : f32 to vector<4x16xf32>
    %119 = arith.mulf %116, %118 : vector<4x16xf32>
    %cst_34 = arith.constant 0.533333361 : f32
    %120 = vector.broadcast %cst_34 : f32 to vector<4x16xf32>
    %121 = arith.mulf %117, %120 : vector<4x16xf32>
    %122 = arith.addf %119, %121 : vector<4x16xf32>
    %123 = vector.extract_strided_slice %23 {offsets = [28, 0], sizes = [4, 16], strides = [1, 1]} : vector<64x16xf32> to vector<4x16xf32>
    %124 = tpu.concatenate %24, %31, %38, %45, %52, %59, %66, %73, %80, %87, %94, %101, %108, %115, %122, %123 in 1 : vector<4x16xf32>, vector<4x16xf32>, vector<4x16xf32>, vector<4x16xf32>, vector<4x16xf32>, vector<4x16xf32>, vector<4x16xf32>, vector<4x16xf32>, vector<4x16xf32>, vector<4x16xf32>, vector<4x16xf32>, vector<4x16xf32>, vector<4x16xf32>, vector<4x16xf32>, vector<4x16xf32>, vector<4x16xf32> -> vector<4x256xf32>
    %c0_35 = arith.constant 0 : index
    %c0_36 = arith.constant 0 : index
    %c0_37 = arith.constant 0 : index
    %125 = vector.load %arg1[%c0_35, %c0_36, %c0_37] : memref<2x4x256xf32, #tpu.memory_space<vmem>>, vector<1x4x256xf32>
    %126 = vector.shape_cast %125 : vector<1x4x256xf32> to vector<4x256xf32>
    %127 = tpu.concatenate %126, %124 in 0 : vector<4x256xf32>, vector<4x256xf32> -> vector<8x256xf32>
    %128 = vector.extract_strided_slice %23 {offsets = [32, 0], sizes = [4, 16], strides = [1, 1]} : vector<64x16xf32> to vector<4x16xf32>
    %129 = vector.extract_strided_slice %23 {offsets = [32, 0], sizes = [4, 16], strides = [1, 1]} : vector<64x16xf32> to vector<4x16xf32>
    %130 = vector.extract_strided_slice %23 {offsets = [36, 0], sizes = [4, 16], strides = [1, 1]} : vector<64x16xf32> to vector<4x16xf32>
    %cst_38 = arith.constant 0.533333361 : f32
    %131 = vector.broadcast %cst_38 : f32 to vector<4x16xf32>
    %132 = arith.mulf %129, %131 : vector<4x16xf32>
    %cst_39 = arith.constant 0.466666669 : f32
    %133 = vector.broadcast %cst_39 : f32 to vector<4x16xf32>
    %134 = arith.mulf %130, %133 : vector<4x16xf32>
    %135 = arith.addf %132, %134 : vector<4x16xf32>
    %136 = vector.extract_strided_slice %23 {offsets = [32, 0], sizes = [4, 16], strides = [1, 1]} : vector<64x16xf32> to vector<4x16xf32>
    %137 = vector.extract_strided_slice %23 {offsets = [36, 0], sizes = [4, 16], strides = [1, 1]} : vector<64x16xf32> to vector<4x16xf32>
    %cst_40 = arith.constant 0.0666666701 : f32
    %138 = vector.broadcast %cst_40 : f32 to vector<4x16xf32>
    %139 = arith.mulf %136, %138 : vector<4x16xf32>
    %cst_41 = arith.constant 0.933333337 : f32
    %140 = vector.broadcast %cst_41 : f32 to vector<4x16xf32>
    %141 = arith.mulf %137, %140 : vector<4x16xf32>
    %142 = arith.addf %139, %141 : vector<4x16xf32>
    %143 = vector.extract_strided_slice %23 {offsets = [36, 0], sizes = [4, 16], strides = [1, 1]} : vector<64x16xf32> to vector<4x16xf32>
    %144 = vector.extract_strided_slice %23 {offsets = [40, 0], sizes = [4, 16], strides = [1, 1]} : vector<64x16xf32> to vector<4x16xf32>
    %cst_42 = arith.constant 6.000000e-01 : f32
    %145 = vector.broadcast %cst_42 : f32 to vector<4x16xf32>
    %146 = arith.mulf %143, %145 : vector<4x16xf32>
    %cst_43 = arith.constant 4.000000e-01 : f32
    %147 = vector.broadcast %cst_43 : f32 to vector<4x16xf32>
    %148 = arith.mulf %144, %147 : vector<4x16xf32>
    %149 = arith.addf %146, %148 : vector<4x16xf32>
    %150 = vector.extract_strided_slice %23 {offsets = [36, 0], sizes = [4, 16], strides = [1, 1]} : vector<64x16xf32> to vector<4x16xf32>
    %151 = vector.extract_strided_slice %23 {offsets = [40, 0], sizes = [4, 16], strides = [1, 1]} : vector<64x16xf32> to vector<4x16xf32>
    %cst_44 = arith.constant 0.13333334 : f32
    %152 = vector.broadcast %cst_44 : f32 to vector<4x16xf32>
    %153 = arith.mulf %150, %152 : vector<4x16xf32>
    %cst_45 = arith.constant 0.866666674 : f32
    %154 = vector.broadcast %cst_45 : f32 to vector<4x16xf32>
    %155 = arith.mulf %151, %154 : vector<4x16xf32>
    %156 = arith.addf %153, %155 : vector<4x16xf32>
    %157 = vector.extract_strided_slice %23 {offsets = [40, 0], sizes = [4, 16], strides = [1, 1]} : vector<64x16xf32> to vector<4x16xf32>
    %158 = vector.extract_strided_slice %23 {offsets = [44, 0], sizes = [4, 16], strides = [1, 1]} : vector<64x16xf32> to vector<4x16xf32>
    %cst_46 = arith.constant 0.666666686 : f32
    %159 = vector.broadcast %cst_46 : f32 to vector<4x16xf32>
    %160 = arith.mulf %157, %159 : vector<4x16xf32>
    %cst_47 = arith.constant 0.333333343 : f32
    %161 = vector.broadcast %cst_47 : f32 to vector<4x16xf32>
    %162 = arith.mulf %158, %161 : vector<4x16xf32>
    %163 = arith.addf %160, %162 : vector<4x16xf32>
    %164 = vector.extract_strided_slice %23 {offsets = [40, 0], sizes = [4, 16], strides = [1, 1]} : vector<64x16xf32> to vector<4x16xf32>
    %165 = vector.extract_strided_slice %23 {offsets = [44, 0], sizes = [4, 16], strides = [1, 1]} : vector<64x16xf32> to vector<4x16xf32>
    %cst_48 = arith.constant 2.000000e-01 : f32
    %166 = vector.broadcast %cst_48 : f32 to vector<4x16xf32>
    %167 = arith.mulf %164, %166 : vector<4x16xf32>
    %cst_49 = arith.constant 8.000000e-01 : f32
    %168 = vector.broadcast %cst_49 : f32 to vector<4x16xf32>
    %169 = arith.mulf %165, %168 : vector<4x16xf32>
    %170 = arith.addf %167, %169 : vector<4x16xf32>
    %171 = vector.extract_strided_slice %23 {offsets = [44, 0], sizes = [4, 16], strides = [1, 1]} : vector<64x16xf32> to vector<4x16xf32>
    %172 = vector.extract_strided_slice %23 {offsets = [48, 0], sizes = [4, 16], strides = [1, 1]} : vector<64x16xf32> to vector<4x16xf32>
    %cst_50 = arith.constant 0.733333349 : f32
    %173 = vector.broadcast %cst_50 : f32 to vector<4x16xf32>
    %174 = arith.mulf %171, %173 : vector<4x16xf32>
    %cst_51 = arith.constant 0.266666681 : f32
    %175 = vector.broadcast %cst_51 : f32 to vector<4x16xf32>
    %176 = arith.mulf %172, %175 : vector<4x16xf32>
    %177 = arith.addf %174, %176 : vector<4x16xf32>
    %178 = vector.extract_strided_slice %23 {offsets = [44, 0], sizes = [4, 16], strides = [1, 1]} : vector<64x16xf32> to vector<4x16xf32>
    %179 = vector.extract_strided_slice %23 {offsets = [48, 0], sizes = [4, 16], strides = [1, 1]} : vector<64x16xf32> to vector<4x16xf32>
    %cst_52 = arith.constant 0.266666681 : f32
    %180 = vector.broadcast %cst_52 : f32 to vector<4x16xf32>
    %181 = arith.mulf %178, %180 : vector<4x16xf32>
    %cst_53 = arith.constant 0.733333349 : f32
    %182 = vector.broadcast %cst_53 : f32 to vector<4x16xf32>
    %183 = arith.mulf %179, %182 : vector<4x16xf32>
    %184 = arith.addf %181, %183 : vector<4x16xf32>
    %185 = vector.extract_strided_slice %23 {offsets = [48, 0], sizes = [4, 16], strides = [1, 1]} : vector<64x16xf32> to vector<4x16xf32>
    %186 = vector.extract_strided_slice %23 {offsets = [52, 0], sizes = [4, 16], strides = [1, 1]} : vector<64x16xf32> to vector<4x16xf32>
    %cst_54 = arith.constant 8.000000e-01 : f32
    %187 = vector.broadcast %cst_54 : f32 to vector<4x16xf32>
    %188 = arith.mulf %185, %187 : vector<4x16xf32>
    %cst_55 = arith.constant 2.000000e-01 : f32
    %189 = vector.broadcast %cst_55 : f32 to vector<4x16xf32>
    %190 = arith.mulf %186, %189 : vector<4x16xf32>
    %191 = arith.addf %188, %190 : vector<4x16xf32>
    %192 = vector.extract_strided_slice %23 {offsets = [48, 0], sizes = [4, 16], strides = [1, 1]} : vector<64x16xf32> to vector<4x16xf32>
    %193 = vector.extract_strided_slice %23 {offsets = [52, 0], sizes = [4, 16], strides = [1, 1]} : vector<64x16xf32> to vector<4x16xf32>
    %cst_56 = arith.constant 0.333333343 : f32
    %194 = vector.broadcast %cst_56 : f32 to vector<4x16xf32>
    %195 = arith.mulf %192, %194 : vector<4x16xf32>
    %cst_57 = arith.constant 0.666666686 : f32
    %196 = vector.broadcast %cst_57 : f32 to vector<4x16xf32>
    %197 = arith.mulf %193, %196 : vector<4x16xf32>
    %198 = arith.addf %195, %197 : vector<4x16xf32>
    %199 = vector.extract_strided_slice %23 {offsets = [52, 0], sizes = [4, 16], strides = [1, 1]} : vector<64x16xf32> to vector<4x16xf32>
    %200 = vector.extract_strided_slice %23 {offsets = [56, 0], sizes = [4, 16], strides = [1, 1]} : vector<64x16xf32> to vector<4x16xf32>
    %cst_58 = arith.constant 0.866666674 : f32
    %201 = vector.broadcast %cst_58 : f32 to vector<4x16xf32>
    %202 = arith.mulf %199, %201 : vector<4x16xf32>
    %cst_59 = arith.constant 0.13333334 : f32
    %203 = vector.broadcast %cst_59 : f32 to vector<4x16xf32>
    %204 = arith.mulf %200, %203 : vector<4x16xf32>
    %205 = arith.addf %202, %204 : vector<4x16xf32>
    %206 = vector.extract_strided_slice %23 {offsets = [52, 0], sizes = [4, 16], strides = [1, 1]} : vector<64x16xf32> to vector<4x16xf32>
    %207 = vector.extract_strided_slice %23 {offsets = [56, 0], sizes = [4, 16], strides = [1, 1]} : vector<64x16xf32> to vector<4x16xf32>
    %cst_60 = arith.constant 4.000000e-01 : f32
    %208 = vector.broadcast %cst_60 : f32 to vector<4x16xf32>
    %209 = arith.mulf %206, %208 : vector<4x16xf32>
    %cst_61 = arith.constant 6.000000e-01 : f32
    %210 = vector.broadcast %cst_61 : f32 to vector<4x16xf32>
    %211 = arith.mulf %207, %210 : vector<4x16xf32>
    %212 = arith.addf %209, %211 : vector<4x16xf32>
    %213 = vector.extract_strided_slice %23 {offsets = [56, 0], sizes = [4, 16], strides = [1, 1]} : vector<64x16xf32> to vector<4x16xf32>
    %214 = vector.extract_strided_slice %23 {offsets = [60, 0], sizes = [4, 16], strides = [1, 1]} : vector<64x16xf32> to vector<4x16xf32>
    %cst_62 = arith.constant 0.933333337 : f32
    %215 = vector.broadcast %cst_62 : f32 to vector<4x16xf32>
    %216 = arith.mulf %213, %215 : vector<4x16xf32>
    %cst_63 = arith.constant 0.0666666701 : f32
    %217 = vector.broadcast %cst_63 : f32 to vector<4x16xf32>
    %218 = arith.mulf %214, %217 : vector<4x16xf32>
    %219 = arith.addf %216, %218 : vector<4x16xf32>
    %220 = vector.extract_strided_slice %23 {offsets = [56, 0], sizes = [4, 16], strides = [1, 1]} : vector<64x16xf32> to vector<4x16xf32>
    %221 = vector.extract_strided_slice %23 {offsets = [60, 0], sizes = [4, 16], strides = [1, 1]} : vector<64x16xf32> to vector<4x16xf32>
    %cst_64 = arith.constant 0.466666669 : f32
    %222 = vector.broadcast %cst_64 : f32 to vector<4x16xf32>
    %223 = arith.mulf %220, %222 : vector<4x16xf32>
    %cst_65 = arith.constant 0.533333361 : f32
    %224 = vector.broadcast %cst_65 : f32 to vector<4x16xf32>
    %225 = arith.mulf %221, %224 : vector<4x16xf32>
    %226 = arith.addf %223, %225 : vector<4x16xf32>
    %227 = vector.extract_strided_slice %23 {offsets = [60, 0], sizes = [4, 16], strides = [1, 1]} : vector<64x16xf32> to vector<4x16xf32>
    %228 = tpu.concatenate %128, %135, %142, %149, %156, %163, %170, %177, %184, %191, %198, %205, %212, %219, %226, %227 in 1 : vector<4x16xf32>, vector<4x16xf32>, vector<4x16xf32>, vector<4x16xf32>, vector<4x16xf32>, vector<4x16xf32>, vector<4x16xf32>, vector<4x16xf32>, vector<4x16xf32>, vector<4x16xf32>, vector<4x16xf32>, vector<4x16xf32>, vector<4x16xf32>, vector<4x16xf32>, vector<4x16xf32>, vector<4x16xf32> -> vector<4x256xf32>
    %c1 = arith.constant 1 : index
    %c0_66 = arith.constant 0 : index
    %c0_67 = arith.constant 0 : index
    %229 = vector.load %arg1[%c1, %c0_66, %c0_67] : memref<2x4x256xf32, #tpu.memory_space<vmem>>, vector<1x4x256xf32>
    %230 = vector.shape_cast %229 : vector<1x4x256xf32> to vector<4x256xf32>
    %231 = tpu.concatenate %230, %228 in 0 : vector<4x256xf32>, vector<4x256xf32> -> vector<8x256xf32>
    %cst_68 = arith.constant 0.000000e+00 : f32
    %232 = vector.broadcast %cst_68 : f32 to vector<8x17xf32>
    %233 = tpu.concatenate %232, %127, %232 in 1 : vector<8x17xf32>, vector<8x256xf32>, vector<8x17xf32> -> vector<8x290xf32>
    %234 = tpu.concatenate %232, %231, %232 in 1 : vector<8x17xf32>, vector<8x256xf32>, vector<8x17xf32> -> vector<8x290xf32>
    %235 = vector.extract_strided_slice %233 {offsets = [0, 0], sizes = [8, 256], strides = [1, 1]} : vector<8x290xf32> to vector<8x256xf32>
    %236 = vector.extract_strided_slice %234 {offsets = [0, 0], sizes = [8, 256], strides = [1, 1]} : vector<8x290xf32> to vector<8x256xf32>
    %237 = tpu.concatenate %235, %236 in 1 : vector<8x256xf32>, vector<8x256xf32> -> vector<8x512xf32>
    %238 = vector.extract_strided_slice %233 {offsets = [0, 16], sizes = [8, 256], strides = [1, 1]} : vector<8x290xf32> to vector<8x256xf32>
    %239 = vector.extract_strided_slice %234 {offsets = [0, 16], sizes = [8, 256], strides = [1, 1]} : vector<8x290xf32> to vector<8x256xf32>
    %240 = tpu.concatenate %238, %239 in 1 : vector<8x256xf32>, vector<8x256xf32> -> vector<8x512xf32>
    %241 = vector.extract_strided_slice %233 {offsets = [0, 32], sizes = [8, 256], strides = [1, 1]} : vector<8x290xf32> to vector<8x256xf32>
    %242 = vector.extract_strided_slice %234 {offsets = [0, 32], sizes = [8, 256], strides = [1, 1]} : vector<8x290xf32> to vector<8x256xf32>
    %243 = tpu.concatenate %241, %242 in 1 : vector<8x256xf32>, vector<8x256xf32> -> vector<8x512xf32>
    %244 = tpu.concatenate %237, %240, %243 in 0 : vector<8x512xf32>, vector<8x512xf32>, vector<8x512xf32> -> vector<24x512xf32>
    %cst_69 = arith.constant 0.000000e+00 : f32
    %245 = vector.shape_cast %18 : vector<1x512xi1> to vector<1x512xi1>
    %246 = vector.broadcast %245 : vector<1x512xi1> to vector<24x512xi1>
    %247 = vector.broadcast %cst_69 : f32 to vector<24x512xf32>
    %248 = arith.select %246, %244, %247 : vector<24x512xi1>, vector<24x512xf32>
    %249 = vector.extract_strided_slice %233 {offsets = [0, 1], sizes = [8, 256], strides = [1, 1]} : vector<8x290xf32> to vector<8x256xf32>
    %250 = vector.extract_strided_slice %234 {offsets = [0, 1], sizes = [8, 256], strides = [1, 1]} : vector<8x290xf32> to vector<8x256xf32>
    %251 = tpu.concatenate %249, %250 in 1 : vector<8x256xf32>, vector<8x256xf32> -> vector<8x512xf32>
    %252 = vector.extract_strided_slice %233 {offsets = [0, 17], sizes = [8, 256], strides = [1, 1]} : vector<8x290xf32> to vector<8x256xf32>
    %253 = vector.extract_strided_slice %234 {offsets = [0, 17], sizes = [8, 256], strides = [1, 1]} : vector<8x290xf32> to vector<8x256xf32>
    %254 = tpu.concatenate %252, %253 in 1 : vector<8x256xf32>, vector<8x256xf32> -> vector<8x512xf32>
    %255 = vector.extract_strided_slice %233 {offsets = [0, 33], sizes = [8, 256], strides = [1, 1]} : vector<8x290xf32> to vector<8x256xf32>
    %256 = vector.extract_strided_slice %234 {offsets = [0, 33], sizes = [8, 256], strides = [1, 1]} : vector<8x290xf32> to vector<8x256xf32>
    %257 = tpu.concatenate %255, %256 in 1 : vector<8x256xf32>, vector<8x256xf32> -> vector<8x512xf32>
    %258 = tpu.concatenate %251, %254, %257 in 0 : vector<8x512xf32>, vector<8x512xf32>, vector<8x512xf32> -> vector<24x512xf32>
    %259 = vector.extract_strided_slice %233 {offsets = [0, 2], sizes = [8, 256], strides = [1, 1]} : vector<8x290xf32> to vector<8x256xf32>
    %260 = vector.extract_strided_slice %234 {offsets = [0, 2], sizes = [8, 256], strides = [1, 1]} : vector<8x290xf32> to vector<8x256xf32>
    %261 = tpu.concatenate %259, %260 in 1 : vector<8x256xf32>, vector<8x256xf32> -> vector<8x512xf32>
    %262 = vector.extract_strided_slice %233 {offsets = [0, 18], sizes = [8, 256], strides = [1, 1]} : vector<8x290xf32> to vector<8x256xf32>
    %263 = vector.extract_strided_slice %234 {offsets = [0, 18], sizes = [8, 256], strides = [1, 1]} : vector<8x290xf32> to vector<8x256xf32>
    %264 = tpu.concatenate %262, %263 in 1 : vector<8x256xf32>, vector<8x256xf32> -> vector<8x512xf32>
    %265 = vector.extract_strided_slice %233 {offsets = [0, 34], sizes = [8, 256], strides = [1, 1]} : vector<8x290xf32> to vector<8x256xf32>
    %266 = vector.extract_strided_slice %234 {offsets = [0, 34], sizes = [8, 256], strides = [1, 1]} : vector<8x290xf32> to vector<8x256xf32>
    %267 = tpu.concatenate %265, %266 in 1 : vector<8x256xf32>, vector<8x256xf32> -> vector<8x512xf32>
    %268 = tpu.concatenate %261, %264, %267 in 0 : vector<8x512xf32>, vector<8x512xf32>, vector<8x512xf32> -> vector<24x512xf32>
    %cst_70 = arith.constant 0.000000e+00 : f32
    %269 = vector.shape_cast %20 : vector<1x512xi1> to vector<1x512xi1>
    %270 = vector.broadcast %269 : vector<1x512xi1> to vector<24x512xi1>
    %271 = vector.broadcast %cst_70 : f32 to vector<24x512xf32>
    %272 = arith.select %270, %268, %271 : vector<24x512xi1>, vector<24x512xf32>
    %273 = tpu.concatenate %248, %258, %272 in 0 : vector<24x512xf32>, vector<24x512xf32>, vector<24x512xf32> -> vector<72x512xf32>
    %c0_71 = arith.constant 0 : index
    %c0_72 = arith.constant 0 : index
    %274 = vector.load %arg4[%c0_71, %c0_72] : memref<4x72xf32, #tpu.memory_space<vmem>>, vector<4x72xf32>
    %cst_73 = arith.constant dense<0.000000e+00> : vector<4x512xf32>
    %275 = tpu.matmul %274, %273, %cst_73 {dimension_numbers = #tpu.dot_dimension_numbers<[1], [0], [0], [1], [0, 0, 1, 1], [], []>} : vector<4x72xf32>, vector<72x512xf32>, vector<4x512xf32> -> vector<4x512xf32>
    %c0_74 = arith.constant 0 : index
    %c0_75 = arith.constant 0 : index
    %276 = vector.load %arg5[%c0_74, %c0_75] : memref<4x1xf32, #tpu.memory_space<vmem>>, vector<4x1xf32>
    %277 = vector.broadcast %276 : vector<4x1xf32> to vector<4x512xf32>
    %278 = arith.addf %275, %277 : vector<4x512xf32>
    %cst_76 = arith.constant 0.000000e+00 : f32
    %279 = vector.broadcast %cst_76 : f32 to vector<4x512xf32>
    %280 = arith.maximumf %278, %279 : vector<4x512xf32>
    %281 = vector.extract_strided_slice %280 {offsets = [0, 0], sizes = [4, 256], strides = [1, 1]} : vector<4x512xf32> to vector<4x256xf32>
    %282 = vector.extract_strided_slice %280 {offsets = [0, 256], sizes = [4, 256], strides = [1, 1]} : vector<4x512xf32> to vector<4x256xf32>
    %cst_77 = arith.constant 0.000000e+00 : f32
    %283 = vector.broadcast %cst_77 : f32 to vector<4x17xf32>
    %284 = tpu.concatenate %283, %281, %283 in 1 : vector<4x17xf32>, vector<4x256xf32>, vector<4x17xf32> -> vector<4x290xf32>
    %285 = tpu.concatenate %283, %282, %283 in 1 : vector<4x17xf32>, vector<4x256xf32>, vector<4x17xf32> -> vector<4x290xf32>
    %286 = vector.extract_strided_slice %284 {offsets = [0, 0], sizes = [4, 256], strides = [1, 1]} : vector<4x290xf32> to vector<4x256xf32>
    %287 = vector.extract_strided_slice %285 {offsets = [0, 0], sizes = [4, 256], strides = [1, 1]} : vector<4x290xf32> to vector<4x256xf32>
    %288 = tpu.concatenate %286, %287 in 1 : vector<4x256xf32>, vector<4x256xf32> -> vector<4x512xf32>
    %289 = vector.extract_strided_slice %284 {offsets = [0, 16], sizes = [4, 256], strides = [1, 1]} : vector<4x290xf32> to vector<4x256xf32>
    %290 = vector.extract_strided_slice %285 {offsets = [0, 16], sizes = [4, 256], strides = [1, 1]} : vector<4x290xf32> to vector<4x256xf32>
    %291 = tpu.concatenate %289, %290 in 1 : vector<4x256xf32>, vector<4x256xf32> -> vector<4x512xf32>
    %292 = vector.extract_strided_slice %284 {offsets = [0, 32], sizes = [4, 256], strides = [1, 1]} : vector<4x290xf32> to vector<4x256xf32>
    %293 = vector.extract_strided_slice %285 {offsets = [0, 32], sizes = [4, 256], strides = [1, 1]} : vector<4x290xf32> to vector<4x256xf32>
    %294 = tpu.concatenate %292, %293 in 1 : vector<4x256xf32>, vector<4x256xf32> -> vector<4x512xf32>
    %295 = tpu.concatenate %288, %291, %294 in 0 : vector<4x512xf32>, vector<4x512xf32>, vector<4x512xf32> -> vector<12x512xf32>
    %cst_78 = arith.constant 0.000000e+00 : f32
    %296 = vector.shape_cast %18 : vector<1x512xi1> to vector<1x512xi1>
    %297 = vector.broadcast %296 : vector<1x512xi1> to vector<12x512xi1>
    %298 = vector.broadcast %cst_78 : f32 to vector<12x512xf32>
    %299 = arith.select %297, %295, %298 : vector<12x512xi1>, vector<12x512xf32>
    %300 = vector.extract_strided_slice %284 {offsets = [0, 1], sizes = [4, 256], strides = [1, 1]} : vector<4x290xf32> to vector<4x256xf32>
    %301 = vector.extract_strided_slice %285 {offsets = [0, 1], sizes = [4, 256], strides = [1, 1]} : vector<4x290xf32> to vector<4x256xf32>
    %302 = tpu.concatenate %300, %301 in 1 : vector<4x256xf32>, vector<4x256xf32> -> vector<4x512xf32>
    %303 = vector.extract_strided_slice %284 {offsets = [0, 17], sizes = [4, 256], strides = [1, 1]} : vector<4x290xf32> to vector<4x256xf32>
    %304 = vector.extract_strided_slice %285 {offsets = [0, 17], sizes = [4, 256], strides = [1, 1]} : vector<4x290xf32> to vector<4x256xf32>
    %305 = tpu.concatenate %303, %304 in 1 : vector<4x256xf32>, vector<4x256xf32> -> vector<4x512xf32>
    %306 = vector.extract_strided_slice %284 {offsets = [0, 33], sizes = [4, 256], strides = [1, 1]} : vector<4x290xf32> to vector<4x256xf32>
    %307 = vector.extract_strided_slice %285 {offsets = [0, 33], sizes = [4, 256], strides = [1, 1]} : vector<4x290xf32> to vector<4x256xf32>
    %308 = tpu.concatenate %306, %307 in 1 : vector<4x256xf32>, vector<4x256xf32> -> vector<4x512xf32>
    %309 = tpu.concatenate %302, %305, %308 in 0 : vector<4x512xf32>, vector<4x512xf32>, vector<4x512xf32> -> vector<12x512xf32>
    %310 = vector.extract_strided_slice %284 {offsets = [0, 2], sizes = [4, 256], strides = [1, 1]} : vector<4x290xf32> to vector<4x256xf32>
    %311 = vector.extract_strided_slice %285 {offsets = [0, 2], sizes = [4, 256], strides = [1, 1]} : vector<4x290xf32> to vector<4x256xf32>
    %312 = tpu.concatenate %310, %311 in 1 : vector<4x256xf32>, vector<4x256xf32> -> vector<4x512xf32>
    %313 = vector.extract_strided_slice %284 {offsets = [0, 18], sizes = [4, 256], strides = [1, 1]} : vector<4x290xf32> to vector<4x256xf32>
    %314 = vector.extract_strided_slice %285 {offsets = [0, 18], sizes = [4, 256], strides = [1, 1]} : vector<4x290xf32> to vector<4x256xf32>
    %315 = tpu.concatenate %313, %314 in 1 : vector<4x256xf32>, vector<4x256xf32> -> vector<4x512xf32>
    %316 = vector.extract_strided_slice %284 {offsets = [0, 34], sizes = [4, 256], strides = [1, 1]} : vector<4x290xf32> to vector<4x256xf32>
    %317 = vector.extract_strided_slice %285 {offsets = [0, 34], sizes = [4, 256], strides = [1, 1]} : vector<4x290xf32> to vector<4x256xf32>
    %318 = tpu.concatenate %316, %317 in 1 : vector<4x256xf32>, vector<4x256xf32> -> vector<4x512xf32>
    %319 = tpu.concatenate %312, %315, %318 in 0 : vector<4x512xf32>, vector<4x512xf32>, vector<4x512xf32> -> vector<12x512xf32>
    %cst_79 = arith.constant 0.000000e+00 : f32
    %320 = vector.shape_cast %20 : vector<1x512xi1> to vector<1x512xi1>
    %321 = vector.broadcast %320 : vector<1x512xi1> to vector<12x512xi1>
    %322 = vector.broadcast %cst_79 : f32 to vector<12x512xf32>
    %323 = arith.select %321, %319, %322 : vector<12x512xi1>, vector<12x512xf32>
    %324 = tpu.concatenate %299, %309, %323 in 0 : vector<12x512xf32>, vector<12x512xf32>, vector<12x512xf32> -> vector<36x512xf32>
    %c0_80 = arith.constant 0 : index
    %c0_81 = arith.constant 0 : index
    %325 = vector.load %arg6[%c0_80, %c0_81] : memref<4x36xf32, #tpu.memory_space<vmem>>, vector<4x36xf32>
    %cst_82 = arith.constant dense<0.000000e+00> : vector<4x512xf32>
    %326 = tpu.matmul %325, %324, %cst_82 {dimension_numbers = #tpu.dot_dimension_numbers<[1], [0], [0], [1], [0, 0, 1, 1], [], []>} : vector<4x36xf32>, vector<36x512xf32>, vector<4x512xf32> -> vector<4x512xf32>
    %c0_83 = arith.constant 0 : index
    %c0_84 = arith.constant 0 : index
    %327 = vector.load %arg7[%c0_83, %c0_84] : memref<4x1xf32, #tpu.memory_space<vmem>>, vector<4x1xf32>
    %328 = vector.broadcast %327 : vector<4x1xf32> to vector<4x512xf32>
    %329 = arith.addf %326, %328 : vector<4x512xf32>
    %cst_85 = arith.constant 0.000000e+00 : f32
    %330 = vector.broadcast %cst_85 : f32 to vector<4x512xf32>
    %331 = arith.maximumf %329, %330 : vector<4x512xf32>
    %332 = vector.extract_strided_slice %331 {offsets = [0, 0], sizes = [4, 256], strides = [1, 1]} : vector<4x512xf32> to vector<4x256xf32>
    %c0_86 = arith.constant 0 : index
    %c0_87 = arith.constant 0 : index
    %c0_88 = arith.constant 0 : index
    %333 = vector.load %arg8[%c0_86, %c0_87, %c0_88] : memref<2x4x256xf32, #tpu.memory_space<vmem>>, vector<1x4x256xf32>
    %334 = vector.shape_cast %333 : vector<1x4x256xf32> to vector<4x256xf32>
    %335 = vector.shape_cast %332 : vector<4x256xf32> to vector<1x4x256xf32>
    tpu.vector_store %arg8[%c0_86, %c0_87, %c0_88], %335 {strides = array<i32>} : memref<2x4x256xf32, #tpu.memory_space<vmem>>, vector<1x4x256xf32>,
    %336 = vector.extract_strided_slice %331 {offsets = [0, 256], sizes = [4, 256], strides = [1, 1]} : vector<4x512xf32> to vector<4x256xf32>
    %c1_89 = arith.constant 1 : index
    %c0_90 = arith.constant 0 : index
    %c0_91 = arith.constant 0 : index
    %337 = vector.load %arg8[%c1_89, %c0_90, %c0_91] : memref<2x4x256xf32, #tpu.memory_space<vmem>>, vector<1x4x256xf32>
    %338 = vector.shape_cast %337 : vector<1x4x256xf32> to vector<4x256xf32>
    %339 = vector.shape_cast %336 : vector<4x256xf32> to vector<1x4x256xf32>
    tpu.vector_store %arg8[%c1_89, %c0_90, %c0_91], %339 {strides = array<i32>} : memref<2x4x256xf32, #tpu.memory_space<vmem>>, vector<1x4x256xf32>,
    return
  }
  func.func @transform_0(%arg0: i32) -> (i32, i32, i32) {
    %c0_i32 = arith.constant 0 : i32
    %c0_i32_0 = arith.constant 0 : i32
    %c0_i32_1 = arith.constant 0 : i32
    return %arg0, %c0_i32, %c0_i32_0 : i32, i32, i32
  }
  func.func @transform_1(%arg0: i32) -> (i32, i32) {
    %c0_i32 = arith.constant 0 : i32
    %c0_i32_0 = arith.constant 0 : i32
    return %arg0, %c0_i32 : i32, i32
  }
  func.func @transform_2(%arg0: i32) -> (i32, i32) {
    %c0_i32 = arith.constant 0 : i32
    %c0_i32_0 = arith.constant 0 : i32
    %c0_i32_1 = arith.constant 0 : i32
    return %c0_i32, %c0_i32_0 : i32, i32
  }
  func.func @transform_3(%arg0: i32) -> (i32, i32) {
    %c0_i32 = arith.constant 0 : i32
    %c0_i32_0 = arith.constant 0 : i32
    %c0_i32_1 = arith.constant 0 : i32
    return %c0_i32, %c0_i32_0 : i32, i32
  }
  func.func @transform_4(%arg0: i32) -> (i32, i32) {
    %c0_i32 = arith.constant 0 : i32
    %c0_i32_0 = arith.constant 0 : i32
    %c0_i32_1 = arith.constant 0 : i32
    return %c0_i32, %c0_i32_0 : i32, i32
  }
  func.func @transform_5(%arg0: i32) -> (i32, i32) {
    %c0_i32 = arith.constant 0 : i32
    %c0_i32_0 = arith.constant 0 : i32
    %c0_i32_1 = arith.constant 0 : i32
    return %c0_i32, %c0_i32_0 : i32, i32
  }
  func.func @transform_6(%arg0: i32) -> (i32, i32) {
    %c0_i32 = arith.constant 0 : i32
    %c0_i32_0 = arith.constant 0 : i32
    %c0_i32_1 = arith.constant 0 : i32
    return %c0_i32, %c0_i32_0 : i32, i32
  }
  func.func @transform_7(%arg0: i32) -> (i32, i32, i32) {
    %c0_i32 = arith.constant 0 : i32
    %c0_i32_0 = arith.constant 0 : i32
    %c0_i32_1 = arith.constant 0 : i32
    return %arg0, %c0_i32, %c0_i32_0 : i32, i32, i32
  }
}

</mosaic_0001>

<bundles_post_ra>
// kernel: unet_up.1
= control target key start
LH: loop header
LB: loop body
LE: loop exit
PB: predicated region body
PF: predicated region fallthrough
CT: control target
= control target key end

     0   :  { %vm96_vm0 = vcmask 64512   ;;  %s1786_s18 = smov 112   ;;  %s1787_s19 = smov 96   ;;  %vm375_vm1 = vcmask 130048   ;;  %vm377_vm2 = vcmask 261120   ;;  %vm379_vm3 = vcmask 392192   ;;  %s2475_s2 = inlined_call_operand.vmem [shape: f32[8,16], index: 2, kind: input, shape index: {}]   ;;  %s2476_s1 = inlined_call_operand.vmem [shape: f32[64,8], index: 1, kind: input, shape index: {}]   ;;  %s2477_s0 = inlined_call_operand.vmem [shape: f32[2,4,256], index: 0, kind: input, shape index: {}]   ;;  %s2478_s4 = inlined_call_operand.vmem [shape: f32[4,1], index: 4, kind: input, shape index: {}]   ;;  %s2479_s3 = inlined_call_operand.vmem [shape: f32[4,72], index: 3, kind: input, shape index: {}]   ;;  %s2480_s6 = inlined_call_operand.vmem [shape: f32[4,1], index: 6, kind: input, shape index: {}]   ;;  %s2481_s5 = inlined_call_operand.vmem [shape: f32[4,36], index: 5, kind: input, shape index: {}]   ;;  %s2482_s7 = inlined_call_operand.vmem [shape: f32[2,4,256], index: 7, kind: output, shape index: {}]  }
   0x1   :  { %v95_v0 = vld [vmem:[%s2475_s2] sm:$0xff]  ;;  %v88_v2 = vld [vmem:[%s2476_s1 + $0x8] sm:$0xff]  ;;  %v89_v3 = vld [vmem:[%s2476_s1 + $0x10] sm:$0xff]  ;;  %s1788_s20 = smov 16   ;;  %s1789_s21 = smov 32   ;;  %vm381_vm4 = vcmask 523264  }
   0x2   :  { %v87_v1 = vld [vmem:[%s2476_s1] sm:$0xff]  ;;  %1472 = vmatprep.subr.mxu0 %v95_v0  ;;  %v90_v4 = vld [vmem:[%s2476_s1 + $0x18] sm:$0xff]  ;;  %v92_v6 = vld [vmem:[%s2476_s1 + $0x28] sm:$0xff]  ;;  %s1790_s22 = smov 48   ;;  %s1791_s23 = smov 64   ;;  %vm383_vm5 = vcmask 654336  }
   0x3   :  { %1474 = vmatprep.mubr.msk.f32.mxu0 %vm96_vm0, %v87_v1  ;;  %1473 = vmatpush3.msra.mxu0 %v95_v0  ;;  %v91_v5 = vld [vmem:[%s2476_s1 + $0x20] sm:$0xff]  ;;  %v93_v7 = vld [vmem:[%s2476_s1 + $0x30] sm:$0xff]  ;;  %v94_v8 = vld [vmem:[%s2476_s1 + $0x38] sm:$0xff]  ;;  %s1785_s1 = smov 80   ;;  %vm2488_vm6 = vcmask 785408   ;;  %vm2485_vm7 = vcmask 916480  }
   0x4   :  { %1475 = vmatmul.mubr.msk.f32.vlgmr.msra.gmra.mrb[0].mxu0 %vm96_vm0, %v88_v2  ;;  %vm2483_vm8 = vcmask 1043456   ;;  %s1792_s26 = smov 17   ;;  %vm2484_vm9 = vcmask 138240   ;;  %s1794_s29 = smov 111   ;;  %vm2491_vm12 = vcmask 1039360   ;;  %vm2487_vm14 = vcmask 908288  }
   0x5   :  { %1477 = vmatprep.mubr.msk.f32.mxu0 %vm96_vm0, %v89_v3  ;;  %s1795_s30 = smov 95   ;;  %s1796_s8 = smov 126   ;;  %vm2486_vm15 = vcmask 777216  }
   0x6   :  { %s1797_s2 = smov 110   ;;  %s1798_s9 = smov 94  }
   0x8   :  { %1478 = vmatmul.mubr.msk.f32.gmra.mrb[2].mxu0 %vm96_vm0, %v90_v4 }
   0x9   :  { %1480 = vmatprep.mubr.msk.f32.mxu0 %vm96_vm0, %v91_v5 }
   0xc   :  { %1481 = vmatmul.mubr.msk.f32.gmra.mrb[4].mxu0 %vm96_vm0, %v92_v6 }
   0xd   :  { %1483 = vmatprep.mubr.msk.f32.mxu0 %vm96_vm0, %v93_v7 }
  0x10   :  { %1484 = vmatmul.mubr.msk.f32.gmra.mrb[6].mxu0 %vm96_vm0, %v94_v8 }
  0xd7   :  { %v1877_v9 = vpop.f32.mrb[0].mxu0 }
  0xd8   :  { %v1879_v10 = vpop.f32.mrb[1].mxu0  ;;  %v251_v11 = vmul.f32 0.33333334, %v1877_v9  ;;  %v257_v12 = vmul.f32 0.8, %v1877_v9 }
  0xd9   :  { %v250_v13 = vmul.f32 0.6666667, %v1877_v9  ;;  %v256_v15 = vmul.f32 0.2, %v1877_v9  ;;  %v226_v18 = vmul.f32 0.53333336, %v1879_v10 }
  0xda   :  { %v253_v14 = vrot.slane %v251_v11, 4  ;;  %v259_v17 = vrot.slane %v257_v12, 4  ;;  %v227_v19 = vmul.f32 0.46666667, %v1879_v10  ;;  %v233_v26 = vmul.f32 0.93333334, %v1879_v10 }
  0xdb   :  { %v1479_v16 = vpop.f32.mrb[2].mxu0  ;;  %v238_v27 = vmul.f32 0.6, %v1879_v10  ;;  %v239_v34 = vmul.f32 0.4, %v1877_v9 }
  0xdc   :  { %v1887_v20 = vpop.f32.mrb[3].mxu0  ;;  %v255_v21 = vadd.f32 %v253_v14, %v250_v13  ;;  %v371_v22 = vrot.slane %v1479_v16, 4  ;;  %v298_v23 = vmul.f32 0.93333334, %v1479_v16  ;;  %v299_v24 = vmul.f32 0.06666667, %v1479_v16 }
  0xdd   :  { %v305_v25 = vmul.f32 0.53333336, %v1479_v16  ;;  %v304_v29 = vmul.f32 0.46666667, %v1479_v16  ;;  %v281_v30 = vmul.f32 0.6666667, %v1887_v20  ;;  %v261_v31 = vadd.f32 %v259_v17, %v256_v15 }
  0xde   :  { %329 = vrot.lane.b32.xlu0 %v255_v21, %s1785_s1  ;;  %372 = vrot.lane.b32.xlu1 %v371_v22, %s1786_s18  ;;  %v301_v28 = vrot.slane %v299_v24, 4  ;;  %v280_v33 = vmul.f32 0.33333334, %v1887_v20  ;;  %v229_v37 = vrot.slane %v227_v19, 4  ;;  %v286_v38 = vmul.f32 0.8666667, %v1887_v20 }
  0xdf   :  { %v307_v32 = vrot.slane %v305_v25, 4  ;;  %v1896_v35 = vpop.f32.mrb[4].mxu0  ;;  %v287_v39 = vmul.f32 0.13333334, %v1479_v16  ;;  %v283_v41 = vrot.slane %v281_v30, 4  ;;  %v241_v42 = vrot.slane %v239_v34, 4 }
  0xe0   :  { %v303_v36 = vadd.f32 %v301_v28, %v298_v23  ;;  %v1899_v40 = vpop.f32.mrb[5].mxu0  ;;  %v244_v43 = vmul.f32 0.13333334, %v1879_v10  ;;  %v245_v44 = vmul.f32 0.8666667, %v1877_v9  ;;  %v231_v52 = vadd.f32 %v229_v37, %v226_v18 }
  0xe1   :  { %v309_v45 = vadd.f32 %v307_v32, %v304_v29  ;;  %v289_v46 = vrot.slane %v287_v39, 4  ;;  %v292_v47 = vmul.f32 0.4, %v1887_v20  ;;  %v293_v48 = vmul.f32 0.6, %v1479_v16 }
  0xe2   :  { %333 = vrot.lane.b32.xlu0 %v261_v31, %s1787_s19  ;;  %363 = vrot.lane.b32.xlu1 %v303_v36, %s1785_s1  ;;  %v243_v49 = vadd.f32 %v241_v42, %v238_v27  ;;  %v247_v50 = vrot.slane %v245_v44, 4  ;;  %v235_v53 = vrot.slane %v233_v26, 4  ;;  %v232_v58 = vmul.f32 0.06666667, %v1879_v10 }
  0xe3   :  { %v1906_v51 = vpop.f32.mrb[6].mxu0  ;;  %v291_v54 = vadd.f32 %v289_v46, %v286_v38  ;;  %v295_v55 = vrot.slane %v293_v48, 4  ;;  %v285_v59 = vadd.f32 %v283_v41, %v280_v33  ;;  %v263_v61 = vmul.f32 0.26666668, %v1887_v20 }
  0xe4   :  { %v1908_v56 = vpop.f32.mrb[7].mxu0  ;;  %v249_v57 = vadd.f32 %v247_v50, %v244_v43  ;;  %v237_v62 = vadd.f32 %v235_v53, %v232_v58  ;;  %v275_v63 = vmul.f32 0.2, %v1887_v20  ;;  %v262_v0 = vmul.f32 0.73333335, %v1877_v9 }
  0xe5   :  { %v297_v60 = vadd.f32 %v295_v55, %v292_v47  ;;  %v265_v1 = vrot.slane %v263_v61, 4  ;;  %v410_v2 = vmul.f32 0.46666667, %v1899_v40  ;;  %v353_v3 = vrot.slane %v291_v54, 4 }
  0xe6   :  { %311 = vrot.lane.b32.xlu0 %v231_v52, %s1788_s20  ;;  %367 = vrot.lane.b32.xlu1 %v309_v45, %s1787_s19  ;;  %v319_v5 = vrot.slane %v243_v49, 4  ;;  %v274_v6 = vmul.f32 0.8, %v1887_v20  ;;  %v277_v7 = vrot.slane %v275_v63, 4  ;;  %v409_v8 = vmul.f32 0.53333336, %v1899_v40 }
  0xe7   :  { %v267_v4 = vadd.f32 %v265_v1, %v262_v0  ;;  %v412_v11 = vrot.slane %v410_v2, 4  ;;  %v481_v12 = vmul.f32 0.93333334, %v1906_v51  ;;  %v482_v13 = vmul.f32 0.06666667, %v1906_v51 }
  0xe8   :  { %v324_v14 = vrot.slane %v249_v57, 4  ;;  %v358_v15 = vrot.slane %v297_v60, 4  ;;  %v421_v16 = vmul.f32 0.6, %v1899_v40  ;;  %v422_v17 = vmul.f32 0.4, %v1896_v35 }
  0xe9   :  { %v279_v18 = vadd.f32 %v277_v7, %v274_v6  ;;  %v488_v19 = vmul.f32 0.53333336, %v1906_v51  ;;  %v469_v21 = vmul.f32 0.8666667, %v1908_v56  ;;  %v470_v22 = vmul.f32 0.13333334, %v1906_v51 }
  0xea   :  { %315 = vrot.lane.b32.xlu0 %v237_v62, %s1789_s21  ;;  %349 = vrot.lane.b32.xlu1 %v285_v59, %s1789_s21  ;;  %v414_v23 = vadd.f32 %v412_v11, %v409_v8  ;;  %v424_v24 = vrot.slane %v422_v17, 4  ;;  %v427_v25 = vmul.f32 0.13333334, %v1899_v40  ;;  %v428_v26 = vmul.f32 0.8666667, %v1896_v35 }
  0xeb   :  { %v484_v27 = vrot.slane %v482_v13, 4  ;;  %v472_v28 = vrot.slane %v470_v22, 4  ;;  %v475_v29 = vmul.f32 0.4, %v1908_v56  ;;  %v476_v30 = vmul.f32 0.6, %v1906_v51 }
  0xec   :  { %v426_v31 = vadd.f32 %v424_v24, %v421_v16  ;;  %v430_v32 = vrot.slane %v428_v26, 4  ;;  %v445_v33 = vmul.f32 0.73333335, %v1896_v35  ;;  %v446_v34 = vmul.f32 0.26666668, %v1908_v56 }
  0xed   :  { %v433_v36 = vmul.f32 0.6666667, %v1896_v35  ;;  %v434_v37 = vmul.f32 0.33333334, %v1896_v35  ;;  %v474_v38 = vadd.f32 %v472_v28, %v469_v21  ;;  %v478_v39 = vrot.slane %v476_v30, 4 }
  0xee   :  { %320 = vrot.lane.b32.xlu0 %v319_v5, %s1790_s22  ;;  %354 = vrot.lane.b32.xlu1 %v353_v3, %s1790_s22  ;;  %v487_v41 = vmul.f32 0.46666667, %v1906_v51  ;;  %v432_v42 = vadd.f32 %v430_v32, %v427_v25  ;;  %v448_v43 = vrot.slane %v446_v34, 4  ;;  %v269_v44 = vmul.f32 0.73333335, %v1887_v20 }
  0xef   :  { %v486_v45 = vadd.f32 %v484_v27, %v481_v12  ;;  %v490_v46 = vrot.slane %v488_v19, 4  ;;  %v458_v47 = vmul.f32 0.2, %v1908_v56  ;;  %v480_v48 = vadd.f32 %v478_v39, %v475_v29 }
  0xf0   :  { %v440_v49 = vmul.f32 0.8, %v1896_v35  ;;  %v450_v50 = vadd.f32 %v448_v43, %v445_v33  ;;  %v268_v52 = vmul.f32 0.26666668, %v1877_v9  ;;  %v271_v53 = vrot.slane %v269_v44, 4 }
  0xf1   :  { %v337_v54 = vrot.slane %v267_v4, 4  ;;  %v436_v55 = vrot.slane %v434_v37, 4  ;;  %v451_v57 = vmul.f32 0.26666668, %v1896_v35  ;;  %v452_v20 = vmul.f32 0.73333335, %v1908_v56 }
  0xf2   :  { %325 = vrot.lane.b32.xlu0 %v324_v14, %s1791_s23  ;;  %359 = vrot.lane.b32.xlu1 %v358_v15, %s1791_s23  ;;  %v1949_v58 = vadd.f32 %v271_v53, %v268_v52  ;;  %v492_v59 = vadd.f32 %v490_v46, %v487_v41  ;;  %v457_v60 = vmul.f32 0.8, %v1908_v56  ;;  %v460_v61 = vrot.slane %v458_v47, 4 }
  0xf3   :  { %v454_v62 = vrot.slane %v452_v20, 4  ;;  %v439_v9 = vmul.f32 0.2, %v1896_v35  ;;  %v442_v63 = vrot.slane %v440_v49, 4  ;;  %v438_v0 = vadd.f32 %v436_v55, %v433_v36 }
  0xf4   :  { %v416_v1 = vmul.f32 0.93333334, %v1899_v40  ;;  %v464_v2 = vmul.f32 0.6666667, %v1908_v56  ;;  %v462_v4 = vadd.f32 %v460_v61, %v457_v60  ;;  %v415_v5 = vmul.f32 0.06666667, %v1899_v40 }
  0xf5   :  { %v1957_v3 = vadd.f32 %v454_v62, %v451_v57  ;;  %v444_v6 = vadd.f32 %v442_v63, %v439_v9  ;;  %v463_v8 = vmul.f32 0.33333334, %v1908_v56  ;;  %v502_v13 = vrot.slane %v426_v31, 4 }
  0xf6   :  { %345 = vrot.lane.b32.xlu0 %v279_v18, %s1788_s20  ;;  %494 = vrot.lane.b32.xlu1 %v414_v23, %s1788_s20  ;;  %v418_v7 = vrot.slane %v416_v1, 4  ;;  %v466_v35 = vrot.slane %v464_v2, 4  ;;  %v536_v14 = vrot.slane %v474_v38, 4  ;;  %v507_v15 = vrot.slane %v432_v42, 4  ;;  %v396_v42 = vld [vmem:[%s2477_s0] sm:$0xff] }
  0xf7   :  { %v541_v16 = vrot.slane %v480_v48, 4  ;;  %v554_v56 = vrot.slane %v1906_v51, 4  ;;  %v520_v17 = vrot.slane %v450_v50, 4  ;;  %v342_v34 = vrot.slane %v1949_v58, 4 }
  0xf8   :  { %v420_v11 = vadd.f32 %v418_v7, %v415_v5  ;;  %v468_v12 = vadd.f32 %v466_v35, %v463_v8  ;;  %v398_v50 = vcombine.high %v396_v42, %v396_v42  ;;  %v525_v9 = vrot.slane %v1957_v3, 4 }
  0xfa   :  { %338 = vrot.lane.b32.xlu0 %v337_v54, %s1786_s18  ;;  %546 = vrot.lane.b32.xlu1 %v486_v45, %s1785_s1 }
  0xfe   :  { %512 = vrot.lane.b32.xlu0 %v438_v0, %s1785_s1  ;;  %550 = vrot.lane.b32.xlu1 %v492_v59, %s1787_s19 }
 0x102   :  { %516 = vrot.lane.b32.xlu0 %v444_v6, %s1787_s19  ;;  %528 = vrot.lane.b32.xlu1 %v462_v4, %s1788_s20 }
 0x106   :  { %498 = vrot.lane.b32.xlu0 %v420_v11, %s1789_s21  ;;  %532 = vrot.lane.b32.xlu1 %v468_v12, %s1789_s21 }
 0x10a   :  { %503 = vrot.lane.b32.xlu0 %v502_v13, %s1790_s22  ;;  %537 = vrot.lane.b32.xlu1 %v536_v14, %s1790_s22 }
 0x10e   :  { %508 = vrot.lane.b32.xlu0 %v507_v15, %s1791_s23  ;;  %542 = vrot.lane.b32.xlu1 %v541_v16, %s1791_s23 }
 0x112   :  { %555 = vrot.lane.b32.xlu1 %v554_v56, %s1786_s18  ;;  %521 = vrot.lane.b32.xlu0 %v520_v17, %s1786_s18 }
 0x150   :  { %v330_v18 = vpop.permute.xlu0 %329  ;;  %v373_v19 = vpop.permute.xlu1 %372 }
 0x154   :  { %v334_v21 = vpop.permute.xlu0 %333  ;;  %v364_v22 = vpop.permute.xlu1 %363 }
 0x158   :  { %v312_v23 = vpop.permute.xlu0 %311  ;;  %v368_v24 = vpop.permute.xlu1 %367 }
 0x159   :  { %v376_v51 = vsel %vm375_vm1, %v1879_v10, %v312_v23 }
 0x15c   :  { %v316_v25 = vpop.permute.xlu0 %315  ;;  %v350_v26 = vpop.permute.xlu1 %349 }
 0x15d   :  { %v378_v29 = vsel %vm377_vm2, %v376_v51, %v316_v25 }
 0x160   :  { %v321_v27 = vpop.permute.xlu0 %320  ;;  %v355_v28 = vpop.permute.xlu1 %354 }
 0x161   :  { %v380_v32 = vsel %vm379_vm3, %v378_v29, %v321_v27 }
 0x164   :  { %v326_v30 = vpop.permute.xlu0 %325  ;;  %v360_v31 = vpop.permute.xlu1 %359 }
 0x165   :  { %v382_v33 = vsel %vm381_vm4, %v380_v32, %v326_v30 }
 0x166   :  { %v384_v38 = vsel %vm383_vm5, %v382_v33, %v330_v18 }
 0x167   :  { %v386_v44 = vsel %vm2488_vm6, %v384_v38, %v334_v21  ;;  %v1799_v38 = vmov 0.0  }
 0x168   :  { %v346_v36 = vpop.permute.xlu0 %345  ;;  %v495_v37 = vpop.permute.xlu1 %494  ;;  %895 = vmatprep.mubr.f32.mxu1 %v1799_v38  ;;  %966 = vmatprep.mubr.f32.mxu0 %v1799_v38 }
 0x169   :  { %v389_v39 = vsel %vm375_vm1, %v342_v34, %v346_v36  ;;  %v558_v1 = vsel %vm375_vm1, %v1899_v40, %v495_v37  ;;  %v1421_v40 = vld [vmem:[%s2477_s0 + $0x8] sm:$0xff]  ;;  %s1793_s0 = smov 127  }
 0x16a   :  { %v390_v10 = vsel %vm377_vm2, %v389_v39, %v350_v26  ;;  %v575_v17 = vcombine.high %v1421_v40, %v1421_v40  ;;  %v1800_v39 = vmov 0  }
 0x16b   :  { %v391_v41 = vsel %vm379_vm3, %v390_v10, %v355_v28  ;;  %1676 = vset.pattern.permute.xlu1 %v1800_v39  ;;  %v821_v10 = vld [vmem:[%s2478_s4] sm:$0xf]  ;;  %1782 = vset.pattern.permute.xlu0 %v1800_v39 }
 0x16c   :  { %v392_v43 = vsel %vm381_vm4, %v391_v41, %v360_v31  ;;  %v339_v45 = vpop.permute.xlu0 %338  ;;  %v547_v46 = vpop.permute.xlu1 %546  ;;  %v26_v41 = vlaneseq }
 0x16d   :  { %v393_v47 = vsel %vm383_vm5, %v392_v43, %v364_v22  ;;  %v388_v48 = vsel %vm2485_vm7, %v386_v44, %v339_v45 }
 0x16e   :  { %v402_v49 = vrot.slane %v388_v48, 4  ;;  %v394_v52 = vsel %vm2488_vm6, %v393_v47, %v368_v24 }
 0x16f   :  { %v395_v53 = vsel %vm2485_vm7, %v394_v52, %v373_v19 }
 0x170   :  { %v513_v54 = vpop.permute.xlu0 %512  ;;  %v551_v55 = vpop.permute.xlu1 %550  ;;  %v407_v57 = vsel %vm2483_vm8, %v396_v42, %v402_v49  ;;  %v403_v20 = vrot.slane %v395_v53, 4  ;;  %v2074_v42 = vand.u32 127, %v26_v41 }
 0x171   :  { %587 = vrot.lane.b32.xlu0 %v407_v57, %s1792_s26 }
 0x172   :  { %v408_v58 = vsel %vm2483_vm8, %v398_v50, %v403_v20  ;;  %v2077_v43 = vadd.s32 128, %v2074_v42  ;;  %v35_v57 = vand.u32 15, %v2074_v42 }
 0x173   :  { %589 = vrot.lane.b32.xlu1 %v408_v58, %s1792_s26 }
 0x174   :  { %v517_v59 = vpop.permute.xlu0 %516  ;;  %v529_v60 = vpop.permute.xlu1 %528  ;;  %v42_v44 = vand.u32 15, %v2077_v43  ;;  %vm2100_vm13 = vcmp.ge.s32.totalorder %v35_v57, 1 }
 0x175   :  { %v565_v2 = vsel %vm375_vm1, %v525_v9, %v529_v60  ;;  %vm1490_vm0 = vmpackc.low %vm2100_vm13, %vm2100_vm13  ;;  %vm2489_vm1 = vmmov 1  }
 0x176   :  { %vm2082_vm10 = vcmp.ge.s32.totalorder %v42_v44, 1 }
 0x177   :  { %vm1487_vm11 = vmpackc.low %vm2082_vm10, %vm2082_vm10 }
 0x178   :  { %v499_v61 = vpop.permute.xlu0 %498  ;;  %v533_v62 = vpop.permute.xlu1 %532 }
 0x179   :  { %v559_v4 = vsel %vm377_vm2, %v558_v1, %v499_v61  ;;  %v566_v5 = vsel %vm377_vm2, %v565_v2, %v533_v62  ;;  %v2110_v1 = vadd.s32 256, %v2074_v42  ;;  %vm2131_vm2 = vmpackc.low %vm2489_vm1, %vm2082_vm10 }
 0x17c   :  { %v504_v63 = vpop.permute.xlu0 %503  ;;  %v538_v0 = vpop.permute.xlu1 %537 }
 0x17d   :  { %v560_v6 = vsel %vm379_vm3, %v559_v4, %v504_v63  ;;  %v567_v7 = vsel %vm379_vm3, %v566_v5, %v538_v0  ;;  %v2107_v0 = vadd.s32 384, %v2074_v42  ;;  %vm2147_vm3 = vmpackc.low %vm2489_vm1, %vm2100_vm13 }
 0x180   :  { %v509_v8 = vpop.permute.xlu0 %508  ;;  %v543_v35 = vpop.permute.xlu1 %542 }
 0x181   :  { %v561_v11 = vsel %vm381_vm4, %v560_v6, %v509_v8  ;;  %v568_v3 = vsel %vm381_vm4, %v567_v7, %v543_v35 }
 0x182   :  { %v562_v12 = vsel %vm383_vm5, %v561_v11, %v513_v54  ;;  %v569_v13 = vsel %vm383_vm5, %v568_v3, %v547_v46 }
 0x183   :  { %v570_v14 = vsel %vm2488_vm6, %v569_v13, %v551_v55  ;;  %v563_v15 = vsel %vm2488_vm6, %v562_v12, %v517_v59 }
 0x184   :  { %v556_v16 = vpop.permute.xlu1 %555  ;;  %v522_v56 = vpop.permute.xlu0 %521 }
 0x185   :  { %v571_v18 = vsel %vm2485_vm7, %v570_v14, %v556_v16  ;;  %v564_v19 = vsel %vm2485_vm7, %v563_v15, %v522_v56  ;;  %v56_v15 = vand.u32 15, %v2107_v0  ;;  %v49_v16 = vand.u32 15, %v2110_v1 }
 0x186   :  { %v580_v21 = vrot.slane %v571_v18, 4  ;;  %v579_v22 = vrot.slane %v564_v19, 4 }
 0x187   :  { %vm2156_vm4 = vcmp.ge.s32.totalorder %v56_v15, 1  ;;  %vm2162_vm5 = vcmp.ge.s32.totalorder %v49_v16, 1 }
 0x188   :  { %v583_v23 = vsel %vm2483_vm8, %v1421_v40, %v579_v22  ;;  %v584_v24 = vsel %vm2483_vm8, %v575_v17, %v580_v21  ;;  %vm1509_vm8 = vmpackc.low %vm2156_vm4, %vm2156_vm4 }
 0x189   :  { %600 = vrot.lane.b32.xlu0 %v583_v23, %s1792_s26  ;;  %602 = vrot.lane.b32.xlu1 %v584_v24, %s1792_s26 }
 0x1e3   :  { %v588_v25 = vpop.permute.xlu0 %587 }
 0x1e4   :  { %v2032_v30 = vsel %vm2484_vm9, 0.0, %v588_v25 }
 0x1e5   :  { %v590_v26 = vpop.permute.xlu1 %589 }
 0x1e6   :  { %v2021_v27 = vsel %vm2484_vm9, %v588_v25, %v590_v26  ;;  %v597_v28 = vsel %vm2484_vm9, %v590_v26, 0.0 }
 0x1e7   :  { %v1576_v51 = vpack.i.bf16 %v597_v28, %v2021_v27 }
 0x1e9   :  { %1577 = vrot.lane.b32.xlu1 %v1576_v51, %s1787_s19  ;;  %1572 = vrot.lane.b32.xlu0 %v1576_v51, %s1786_s18 }
 0x1ed   :  { %1582 = vrot.lane.b32.xlu1 %v1576_v51, %s1793_s0 }
 0x1f1   :  { %1587 = vrot.lane.b32.xlu1 %v1576_v51, %s1794_s29 }
 0x1f5   :  { %1592 = vrot.lane.b32.xlu1 %v1576_v51, %s1795_s30 }
 0x1f9   :  { %1597 = vrot.lane.b32.xlu1 %v1576_v51, %s1796_s8 }
 0x1fb   :  { %v601_v29 = vpop.permute.xlu0 %600  ;;  %v603_v33 = vpop.permute.xlu1 %602 }
 0x1fc   :  { %v2035_v31 = vsel %vm2484_vm9, 0.0, %v601_v29  ;;  %v2042_v34 = vsel %vm2484_vm9, %v601_v29, %v603_v33  ;;  %v609_v36 = vsel %vm2484_vm9, %v603_v33, 0.0  ;;  %vm2493_vm9 = vcmask 900096  }
 0x1fd   :  { %v1606_v32 = vpack.i.bf16 %v2035_v31, %v2032_v30  ;;  %v1626_v37 = vpack.i.bf16 %v609_v36, %v2042_v34 }
 0x1ff   :  { %1607 = vrot.lane.b32.xlu1 %v1606_v32, %s1787_s19  ;;  %1602 = vrot.lane.b32.xlu0 %v1606_v32, %s1786_s18 }
 0x203   :  { %1617 = vrot.lane.b32.xlu1 %v1606_v32, %s1794_s29  ;;  %1612 = vrot.lane.b32.xlu0 %v1606_v32, %s1793_s0 }
 0x207   :  { %1622 = vrot.lane.b32.xlu0 %v1606_v32, %s1795_s30  ;;  %1627 = vrot.lane.b32.xlu1 %v1626_v37, %s1786_s18 }
 0x20b   :  { %1642 = vrot.lane.b32.xlu0 %v1606_v32, %s1797_s2  ;;  %1632 = vrot.lane.b32.xlu1 %v1576_v51, %s1797_s2 }
 0x20f   :  { %783 = vrot.lane.b32.xlu0 %v597_v28, %s1798_s9  ;;  %1637 = vrot.lane.b32.xlu1 %v1606_v32, %s1796_s8 }
 0x213   :  { %1647 = vrot.lane.b32.xlu0 %v1626_v37, %s1787_s19  ;;  %781 = vrot.lane.b32.xlu1 %v2021_v27, %s1798_s9 }
 0x217   :  { %1652 = vrot.lane.b32.xlu0 %v1626_v37, %s1793_s0  ;;  %792 = vrot.lane.b32.xlu1 %v2042_v34, %s1798_s9 }
 0x21b   :  { %1657 = vrot.lane.b32.xlu0 %v1626_v37, %s1794_s29  ;;  %779 = vrot.lane.b32.xlu1 %v2032_v30, %s1798_s9 }
 0x21f   :  { %1662 = vrot.lane.b32.xlu0 %v1626_v37, %s1795_s30  ;;  %824 = vperm.xlu1 %1676, %v821_v10  }
 0x223   :  { %1667 = vrot.lane.b32.xlu0 %v1626_v37, %s1796_s8 }
 0x227   :  { %1672 = vrot.lane.b32.xlu0 %v1626_v37, %s1797_s2 }
 0x22b   :  { %794 = vrot.lane.b32.xlu0 %v609_v36, %s1798_s9 }
 0x22f   :  { %790 = vrot.lane.b32.xlu0 %v2035_v31, %s1798_s9 }
 0x25b   :  { %v1573_v45 = vpop.permute.xlu0 %1572  ;;  %v1578_v46 = vpop.permute.xlu1 %1577 }
 0x25c   :  { %v1575_v48 = vunpack.i.h.bf16 %v1573_v45  ;;  %v1574_v49 = vunpack.i.l.bf16 %v1573_v45  ;;  %v1580_v61 = vunpack.i.h.bf16 %v1578_v46  ;;  %v1579_v62 = vunpack.i.l.bf16 %v1578_v46 }
 0x25e   :  { %v619_v50 = vsel %vm2485_vm7, %v1574_v49, %v1575_v48  ;;  %v641_v3 = vsel %vm2488_vm6, %v1579_v62, %v1580_v61 }
 0x25f   :  { %v1583_v52 = vpop.permute.xlu1 %1582  ;;  %v1486_v53 = vpack.c.bf16 %v619_v50, %v2021_v27 }
 0x260   :  { %v1585_v58 = vunpack.i.h.bf16 %v1583_v52  ;;  %v1584_v59 = vunpack.i.l.bf16 %v1583_v52 }
 0x261   :  { %1488 = vmatprep.subr.msk.bf16.mxu1 %vm1487_vm11, %v1486_v53  ;;  %vm2169_vm11 = vcmp.le.s32.totalorder %v42_v44, 14 }
 0x262   :  { %v682_v6 = vsel %vm2491_vm12, %v1584_v59, %v1585_v58 }
 0x263   :  { %v2091_v54 = vpop.permute.xlu1 %1587  ;;  %v1492_v56 = vpack.c.bf16 %v682_v6, %v641_v3 }
 0x264   :  { %v1590_v7 = vunpack.i.h.bf16 %v2091_v54  ;;  %v1589_v8 = vunpack.i.l.bf16 %v2091_v54 }
 0x266   :  { %v703_v24 = vsel %vm2487_vm14, %v1589_v8, %v1590_v7 }
 0x267   :  { %v2093_v55 = vpop.permute.xlu1 %1592 }
 0x268   :  { %v1595_v2 = vunpack.i.h.bf16 %v2093_v55  ;;  %v1594_v4 = vunpack.i.l.bf16 %v2093_v55 }
 0x26a   :  { %v724_v18 = vsel %vm2486_vm15, %v1594_v4, %v1595_v2 }
 0x26b   :  { %v2096_v20 = vpop.permute.xlu1 %1597  ;;  %v1498_v28 = vpack.c.bf16 %v724_v18, %v703_v24 }
 0x26c   :  { %v1600_v39 = vunpack.i.h.bf16 %v2096_v20  ;;  %v1599_v10 = vunpack.i.l.bf16 %v2096_v20 }
 0x271   :  { %v1603_v9 = vpop.permute.xlu0 %1602  ;;  %v2104_v63 = vpop.permute.xlu1 %1607 }
 0x272   :  { %v1604_v5 = vunpack.i.l.bf16 %v1603_v9  ;;  %v1609_v35 = vunpack.i.l.bf16 %v2104_v63 }
 0x274   :  { %v618_v11 = vsel %vm2485_vm7, %v1604_v5, %v1574_v49  ;;  %v640_v19 = vsel %vm2488_vm6, %v1609_v35, %v1579_v62 }
 0x275   :  { %v2123_v40 = vpop.permute.xlu0 %1612  ;;  %v2125_v12 = vpop.permute.xlu1 %1617  ;;  %v1489_v13 = vpack.c.bf16 %v618_v11, %v2032_v30  ;;  %v1605_v30 = vunpack.i.h.bf16 %v1603_v9  ;;  %v1610_v11 = vunpack.i.h.bf16 %v2104_v63 }
 0x276   :  { %v1614_v17 = vunpack.i.l.bf16 %v2123_v40  ;;  %v1619_v22 = vunpack.i.l.bf16 %v2125_v12  ;;  %v1615_v3 = vunpack.i.h.bf16 %v2123_v40 }
 0x277   :  { %1491 = vmatpush1.bf16.msk.msra.mxu1 %vm1490_vm0, %v1489_v13  ;;  %vm743_vm0 = vcmask 1031168  }
 0x278   :  { %v681_v21 = vsel %vm2491_vm12, %v1614_v17, %v1584_v59  ;;  %1494 = vmatprep.subr.msk.bf16.mxu1 %vm2131_vm2, %v1492_v56  ;;  %v702_v46 = vsel %vm2487_vm14, %v1619_v22, %v1589_v8  ;;  %v745_v55 = vsel %vm743_vm0, %v1599_v10, %v1600_v39  ;;  %vm2201_vm14 = vcmp.le.s32.totalorder %v35_v57, 14 }
 0x279   :  { %v1495_v25 = vpack.c.bf16 %v681_v21, %v640_v19  ;;  %v2152_v26 = vpop.permute.xlu0 %1622  ;;  %v1628_v27 = vpop.permute.xlu1 %1627  ;;  %v2513_v22 = vmov 0  ;;  %v1620_v39 = vunpack.i.h.bf16 %v2125_v12 }
 0x27a   :  { %v1624_v32 = vunpack.i.l.bf16 %v2152_v26  ;;  %v1630_v33 = vunpack.i.h.bf16 %v1628_v27  ;;  %v1629_v36 = vunpack.i.l.bf16 %v1628_v27  ;;  %v820_v27 = vld [vmem:[%s2479_s3] sm:$0xf] }
 0x27b   :  { %1497 = vmatpush1.bf16.msk.msra.mxu1 %vm2147_vm3, %v1495_v25 }
 0x27c   :  { %v630_v41 = vsel %vm2485_vm7, %v1605_v30, %v1629_v36  ;;  %v631_v45 = vsel %vm2485_vm7, %v1629_v36, %v1630_v33  ;;  %1499 = vmatprep.subr.bf16.mxu1 %v1498_v28  ;;  %v723_v43 = vsel %vm2486_vm15, %v1624_v32, %v1594_v4  ;;  %vm1512_vm7 = vmpackc.low %vm2162_vm5, %vm2162_vm5  ;;  %v2515_v28 = vmov 0 }
 0x27d   :  { %v1508_v44 = vpack.c.bf16 %v631_v45, %v2042_v34  ;;  %v1511_v48 = vpack.c.bf16 %v630_v41, %v2035_v31  ;;  %v2186_v49 = vpop.permute.xlu0 %1642  ;;  %v1633_v50 = vpop.permute.xlu1 %1632  ;;  %v1500_v52 = vpack.c.bf16 %v723_v43, %v702_v46  ;;  %vm1503_vm15 = vmpackc.low %vm2169_vm11, %vm2169_vm11 }
 0x27e   :  { %v1635_v53 = vunpack.i.h.bf16 %v1633_v50  ;;  %v1634_v54 = vunpack.i.l.bf16 %v1633_v50  ;;  %v1644_v20 = vunpack.i.l.bf16 %v2186_v49 }
 0x27f   :  { %1501 = vmatpush1.bf16.msra.mxu1 %v1500_v52  ;;  %1510 = vmatprep.subr.msk.bf16.mxu0 %vm1509_vm8, %v1508_v44  ;;  %vm2492_vm8 = vcmask 769024  }
 0x280   :  { %v766_v34 = vsel %vm2493_vm9, %v1634_v54, %v1635_v53  ;;  %1513 = vmatpush1.bf16.msk.msra.mxu0 %vm1512_vm7, %v1511_v48  ;;  %v765_v9 = vsel %vm2493_vm9, %v1644_v20, %v1634_v54  ;;  %vm1506_vm7 = vmpackc.low %vm2201_vm14, %vm2201_vm14 }
 0x281   :  { %v1502_v31 = vpack.c.bf16 %v766_v34, %v745_v55  ;;  %v784_v58 = vpop.permute.xlu0 %783  ;;  %v2197_v59 = vpop.permute.xlu1 %1637  ;;  %v1645_v34 = vunpack.i.h.bf16 %v2186_v49 }
 0x282   :  { %v1639_v62 = vunpack.i.l.bf16 %v2197_v59 }
 0x283   :  { %1504 = vmatprep.subr.msk.bf16.mxu1 %vm1503_vm15, %v1502_v31  ;;  %vm2225_vm15 = vmpackc.low %vm2489_vm1, %vm2156_vm4  ;;  %v1640_v31 = vunpack.i.h.bf16 %v2197_v59 }
 0x284   :  { %v744_v2 = vsel %vm743_vm0, %v1639_v62, %v1599_v10  ;;  %v2514_v22 = vsel %vm2225_vm15, 4294967295, %v2513_v22  ;;  %v1625_v10 = vunpack.i.h.bf16 %v2152_v26 }
 0x285   :  { %v1505_v4 = vpack.c.bf16 %v765_v9, %v744_v2  ;;  %v1648_v5 = vpop.permute.xlu0 %1647  ;;  %v782_v6 = vpop.permute.xlu1 %781 }
 0x286   :  { %v787_v42 = vsel %vm2492_vm8, %v782_v6, %v784_v58  ;;  %v1650_v57 = vunpack.i.h.bf16 %v1648_v5  ;;  %v1649_v7 = vunpack.i.l.bf16 %v1648_v5 }
 0x287   :  { %1507 = vmatpush1.bf16.msk.msra.mxu1 %vm1506_vm7, %v1505_v4  ;;  %vm2494_vm7 = vcmask 588800  }
 0x288   :  { %1432 = vmatprep.subr.msk.mxu1 %vm2169_vm11, %v787_v42  ;;  %v650_v17 = vsel %vm2488_vm6, %v1610_v11, %v1649_v7  ;;  %v651_v18 = vsel %vm2488_vm6, %v1649_v7, %v1650_v57  ;;  %vm2235_vm6 = vmpackc.low %vm2489_vm1, %vm2162_vm5  ;;  %vm2517_vm1 = vcmask 908288  }
 0x289   :  { %v1653_v8 = vpop.permute.xlu0 %1652  ;;  %v2214_v35 = vpop.permute.xlu1 %792  ;;  %v2516_v28 = vsel %vm2235_vm6, 4294967295, %v2515_v28 }
 0x28a   :  { %v1655_v13 = vunpack.i.h.bf16 %v1653_v8  ;;  %v1654_v56 = vunpack.i.l.bf16 %v1653_v8 }
 0x28c   :  { %v691_v19 = vsel %vm2491_vm12, %v1615_v3, %v1654_v56  ;;  %v692_v21 = vsel %vm2491_vm12, %v1654_v56, %v1655_v13  ;;  %vm2518_vm12 = vcmask 777216  }
 0x28d   :  { %v1514_v63 = vpack.c.bf16 %v692_v21, %v651_v18  ;;  %v1517_v24 = vpack.c.bf16 %v691_v19, %v650_v17  ;;  %v1658_v40 = vpop.permute.xlu0 %1657  ;;  %v780_v25 = vpop.permute.xlu1 %779  ;;  %vm2520_vm9 = vmmov %vm2518_vm12 }
 0x28e   :  { %v786_v30 = vsel %vm2492_vm8, %v780_v25, %v782_v6  ;;  %v1660_v32 = vunpack.i.h.bf16 %v1658_v40  ;;  %v1659_v33 = vunpack.i.l.bf16 %v1658_v40  ;;  %vm2519_vm8 = vmmov %vm2517_vm1 }
 0x28f   :  { %1433 = vmatpush1.msk.msra.mxu1 %vm2201_vm14, %v786_v30  ;;  %1516 = vmatprep.subr.msk.bf16.mxu0 %vm2225_vm15, %v1514_v63  ;;  %vm2527_vm15 = vcmask 769024  }
 0x290   :  { %1434 = vmatmul.mubr.msk.f32.vlgmr.msra.gmra.mrb[0].mxu1 %vm2494_vm7, %v820_v27  ;;  %1519 = vmatpush1.bf16.msk.msra.mxu0 %vm2235_vm6, %v1517_v24  ;;  %v712_v46 = vsel %vm2517_vm1, %v1620_v39, %v1659_v33  ;;  %v713_v44 = vsel %vm2519_vm8, %v1659_v33, %v1660_v32  ;;  %vm2256_vm7 = vcmp.le.s32.totalorder %v56_v15, 14 }
 0x291   :  { %v1663_v36 = vpop.permute.xlu0 %1662  ;;  %1316 = vmatprep.mubr.f32.mxu1 %v1799_v38  ;;  %vm1525_vm8 = vmpackc.low %vm2256_vm7, %vm2256_vm7 }
 0x292   :  { %v1665_v41 = vunpack.i.h.bf16 %v1663_v36  ;;  %v1664_v45 = vunpack.i.l.bf16 %v1663_v36 }
 0x294   :  { %v733_v43 = vsel %vm2518_vm12, %v1625_v10, %v1664_v45  ;;  %v734_v48 = vsel %vm2520_vm9, %v1664_v45, %v1665_v41  ;;  %vm2262_vm12 = vcmp.le.s32.totalorder %v49_v16, 14  ;;  %vm2525_vm9 = vcmask 900096   ;;  %v1230_v41 = vld [vmem:[%s2480_s6] sm:$0xf] }
 0x295   :  { %v1522_v50 = vpack.c.bf16 %v733_v43, %v712_v46  ;;  %v1668_v52 = vpop.permute.xlu0 %1667  ;;  %v1520_v53 = vpack.c.bf16 %v734_v48, %v713_v44  ;;  %vm2526_vm1 = vmmov %vm2525_vm9 }
 0x296   :  { %v1670_v54 = vunpack.i.h.bf16 %v1668_v52  ;;  %v1669_v55 = vunpack.i.l.bf16 %v1668_v52  ;;  %vm1528_vm6 = vmpackc.low %vm2262_vm12, %vm2262_vm12 }
 0x297   :  { %1521 = vmatprep.subr.bf16.mxu0 %v1520_v53 }
 0x298   :  { %1523 = vmatpush1.bf16.msra.mxu0 %v1522_v50  ;;  %v754_v9 = vsel %vm743_vm0, %v1640_v31, %v1669_v55  ;;  %v755_v0 = vsel %vm743_vm0, %v1669_v55, %v1670_v54 }
 0x299   :  { %v1673_v12 = vpop.permute.xlu0 %1672 }
 0x29a   :  { %v1675_v58 = vunpack.i.h.bf16 %v1673_v12  ;;  %v1674_v62 = vunpack.i.l.bf16 %v1673_v12 }
 0x29c   :  { %v775_v15 = vsel %vm2525_vm9, %v1645_v34, %v1674_v62  ;;  %v776_v2 = vsel %vm2526_vm1, %v1674_v62, %v1675_v58  ;;  %vm2528_vm9 = vmmov %vm2527_vm15  ;;  %vm2529_vm1 = vcmask 588800  }
 0x29d   :  { %v1524_v1 = vpack.c.bf16 %v776_v2, %v755_v0  ;;  %v1527_v16 = vpack.c.bf16 %v775_v15, %v754_v9  ;;  %v795_v4 = vpop.permute.xlu0 %794 }
 0x29e   :  { %v797_v49 = vsel %vm2527_vm15, %v2214_v35, %v795_v4  ;;  %v825_v6 = vpop.permute.xlu1 %824 }
 0x29f   :  { %1526 = vmatprep.subr.msk.bf16.mxu0 %vm1525_vm8, %v1524_v1 }
 0x2a0   :  { %1529 = vmatpush1.bf16.msk.msra.mxu0 %vm1528_vm6, %v1527_v16  ;;  %vm2530_vm6 = vcmask 138240  }
 0x2a1   :  { %v791_v59 = vpop.permute.xlu0 %790  ;;  %1445 = vmatprep.subr.msk.mxu0 %vm2256_vm7, %v797_v49  ;;  %vm2531_vm15 = vmmov %vm2530_vm6 }
 0x2a2   :  { %v796_v5 = vsel %vm2528_vm9, %v791_v59, %v2214_v35  ;;  %vm2532_vm8 = vmmov %vm2530_vm6 }
 0x2a3   :  { %vm2533_vm9 = vmmov %vm2530_vm6 }
 0x2a4   :  { %1446 = vmatpush1.msk.msra.mxu0 %vm2262_vm12, %v796_v5 }
 0x2a5   :  { %1447 = vmatmul.mubr.msk.f32.vlgmr.msra.gmra.mrb[8].mxu0 %vm2529_vm1, %v820_v27  ;;  %vm2534_vm1 = vmmov %vm2530_vm6 }
 0x2a6   :  { %1387 = vmatprep.mubr.f32.mxu0 %v1799_v38 }
 0x363   :  { %v897_v42 = vpop.f32.mrb[0].mxu1 }
 0x364   :  { %v899_v57 = vpop.f32.mrb[1].mxu1  ;;  %v898_v7 = vadd.f32 %v897_v42, %v825_v6 }
 0x365   :  { %v900_v8 = vadd.f32 %v899_v57, %v825_v6 }
 0x366   :  { %v973_v11 = vmax.f32 %v898_v7, 0.0 }
 0x367   :  { %v974_v3 = vmax.f32 %v900_v8, 0.0 }
 0x368   :  { %979 = vrot.lane.b32.xlu0 %v973_v11, %s1792_s26 }
 0x369   :  { %981 = vrot.lane.b32.xlu1 %v974_v3, %s1792_s26 }
 0x378   :  { %v968_v13 = vpop.f32.mrb[8].mxu0 }
 0x379   :  { %v969_v35 = vadd.f32 %v968_v13, %v825_v6  ;;  %v970_v56 = vpop.f32.mrb[9].mxu0 }
 0x37a   :  { %v971_v17 = vadd.f32 %v970_v56, %v825_v6 }
 0x37b   :  { %v975_v18 = vmax.f32 %v969_v35, 0.0 }
 0x37c   :  { %v976_v19 = vmax.f32 %v971_v17, 0.0 }
 0x37d   :  { %991 = vrot.lane.b32.xlu0 %v975_v18, %s1792_s26 }
 0x37e   :  { %993 = vrot.lane.b32.xlu1 %v976_v19, %s1792_s26 }
 0x3da   :  { %v980_v38 = vpop.permute.xlu0 %979 }
 0x3db   :  { %v982_v21 = vpop.permute.xlu1 %981  ;;  %v2307_v27 = vsel %vm2532_vm8, 0.0, %v980_v38  ;;  %vm2537_vm8 = vcmask 1039360  }
 0x3dc   :  { %v988_v63 = vsel %vm2530_vm6, %v982_v21, 0.0  ;;  %v2294_v24 = vsel %vm2531_vm15, %v980_v38, %v982_v21  ;;  %vm2535_vm6 = vmmov %vm2534_vm1  ;;  %vm2536_vm15 = vcmask 908288  }
 0x3dd   :  { %v1682_v40 = vpack.i.bf16 %v988_v63, %v2294_v24 }
 0x3df   :  { %1683 = vrot.lane.b32.xlu1 %v1682_v40, %s1793_s0  ;;  %1678 = vrot.lane.b32.xlu0 %v1682_v40, %s1794_s29 }
 0x3e3   :  { %1688 = vrot.lane.b32.xlu1 %v1682_v40, %s1786_s18  ;;  %1698 = vrot.lane.b32.xlu0 %v1682_v40, %s1795_s30 }
 0x3e7   :  { %1693 = vrot.lane.b32.xlu1 %v1682_v40, %s1787_s19  ;;  %1703 = vrot.lane.b32.xlu0 %v1682_v40, %s1797_s2 }
 0x3eb   :  { %1163 = vrot.lane.b32.xlu1 %v2294_v24, %s1798_s9  ;;  %1708 = vrot.lane.b32.xlu0 %v1682_v40, %s1796_s8 }
 0x3ef   :  { %v992_v25 = vpop.permute.xlu0 %991 }
 0x3f0   :  { %v2310_v30 = vsel %vm2533_vm9, 0.0, %v992_v25  ;;  %v994_v33 = vpop.permute.xlu1 %993  ;;  %vm2538_vm9 = vcmask 916480  }
 0x3f1   :  { %v1717_v32 = vpack.i.bf16 %v2310_v30, %v2307_v27  ;;  %v2319_v36 = vsel %vm2534_vm1, %v992_v25, %v994_v33  ;;  %v1000_v39 = vsel %vm2535_vm6, %v994_v33, 0.0  ;;  %vm2539_vm1 = vcmask 1043456  }
 0x3f2   :  { %v1747_v10 = vpack.i.bf16 %v1000_v39, %v2319_v36  ;;  %vm2540_vm6 = vcmask 785408  }
 0x3f3   :  { %1718 = vrot.lane.b32.xlu1 %v1717_v32, %s1793_s0  ;;  %1713 = vrot.lane.b32.xlu0 %v1717_v32, %s1794_s29 }
 0x3f7   :  { %1728 = vrot.lane.b32.xlu1 %v1717_v32, %s1787_s19  ;;  %1723 = vrot.lane.b32.xlu0 %v1717_v32, %s1786_s18 }
 0x3fb   :  { %1738 = vrot.lane.b32.xlu1 %v1717_v32, %s1797_s2  ;;  %1733 = vrot.lane.b32.xlu0 %v1717_v32, %s1795_s30 }
 0x3ff   :  { %1743 = vrot.lane.b32.xlu0 %v1717_v32, %s1796_s8  ;;  %1748 = vrot.lane.b32.xlu1 %v1747_v10, %s1794_s29 }
 0x403   :  { %1753 = vrot.lane.b32.xlu0 %v1747_v10, %s1793_s0  ;;  %1768 = vrot.lane.b32.xlu1 %v1747_v10, %s1795_s30 }
 0x407   :  { %1758 = vrot.lane.b32.xlu0 %v1747_v10, %s1786_s18  ;;  %1773 = vrot.lane.b32.xlu1 %v1747_v10, %s1797_s2 }
 0x40b   :  { %1763 = vrot.lane.b32.xlu0 %v1747_v10, %s1787_s19  ;;  %1778 = vrot.lane.b32.xlu1 %v1747_v10, %s1796_s8 }
 0x40f   :  { %1165 = vrot.lane.b32.xlu0 %v988_v63, %s1798_s9  ;;  %1173 = vrot.lane.b32.xlu1 %v2319_v36, %s1798_s9 }
 0x413   :  { %1175 = vrot.lane.b32.xlu0 %v1000_v39, %s1798_s9  ;;  %1161 = vrot.lane.b32.xlu1 %v2307_v27, %s1798_s9 }
 0x417   :  { %1171 = vrot.lane.b32.xlu0 %v2310_v30, %s1798_s9  ;;  %1233 = vperm.xlu1 %1676, %v1230_v41  }
 0x451   :  { %v1684_v45 = vpop.permute.xlu1 %1683  ;;  %v1679_v46 = vpop.permute.xlu0 %1678 }
 0x452   :  { %v1686_v43 = vunpack.i.h.bf16 %v1684_v45  ;;  %v1685_v44 = vunpack.i.l.bf16 %v1684_v45  ;;  %v1681_v48 = vunpack.i.h.bf16 %v1679_v46  ;;  %v1680_v50 = vunpack.i.l.bf16 %v1679_v46 }
 0x454   :  { %v1088_v52 = vsel %vm2536_vm15, %v1680_v50, %v1681_v48  ;;  %v1068_v12 = vsel %vm2537_vm8, %v1685_v44, %v1686_v43  ;;  %vm2541_vm15 = vmmov %vm2539_vm1 }
 0x455   :  { %v1114_v53 = vrot.slane %v1088_v52, 4  ;;  %v1689_v54 = vpop.permute.xlu1 %1688  ;;  %v1699_v55 = vpop.permute.xlu0 %1698  ;;  %vm2542_vm8 = vmmov %vm2539_vm1 }
 0x456   :  { %v1691_v34 = vunpack.i.h.bf16 %v1689_v54  ;;  %v1690_v31 = vunpack.i.l.bf16 %v1689_v54  ;;  %v1701_v7 = vunpack.i.h.bf16 %v1699_v55  ;;  %v1700_v8 = vunpack.i.l.bf16 %v1699_v55 }
 0x457   :  { %v1122_v62 = vsel %vm2539_vm1, %v1068_v12, %v1114_v53  ;;  %vm2545_vm1 = vcmask 900096  }
 0x458   :  { %v1010_v58 = vsel %vm2538_vm9, %v1690_v31, %v1691_v34  ;;  %v1206_v16 = vrot.slane %v1122_v62, 4  ;;  %vm2544_vm9 = vcmask 908288  }
 0x459   :  { %v1694_v9 = vpop.permute.xlu1 %1693  ;;  %v1042_v0 = vrot.slane %v1010_v58, 4  ;;  %v1704_v1 = vpop.permute.xlu0 %1703 }
 0x45a   :  { %v1696_v15 = vunpack.i.h.bf16 %v1694_v9  ;;  %v1695_v2 = vunpack.i.l.bf16 %v1694_v9  ;;  %v1706_v11 = vunpack.i.h.bf16 %v1704_v1  ;;  %v1705_v3 = vunpack.i.l.bf16 %v1704_v1 }
 0x45b   :  { %v1050_v59 = vsel %vm2541_vm15, %v2294_v24, %v1042_v0  ;;  %vm2548_vm15 = vcmask 785408  }
 0x45c   :  { %v1028_v4 = vsel %vm2540_vm6, %v1695_v2, %v1696_v15  ;;  %v1152_v21 = vsel %vm2545_vm1, %v1705_v3, %v1706_v11  ;;  %vm2547_vm6 = vmmov %vm2542_vm8 }
 0x45d   :  { %v1058_v49 = vsel %vm2082_vm10, %v1028_v4, 0.0  ;;  %v2354_v42 = vpop.permute.xlu1 %1163  ;;  %v1709_v57 = vpop.permute.xlu0 %1708  ;;  %vm2543_vm10 = vcmask 777216   ;;  %v1182_v41 = vrot.slane %v1152_v21, 4  ;;  %vm2552_vm1 = vmmov %vm2547_vm6 }
 0x45e   :  { %v1226_v5 = vsel %vm2542_vm8, %v1058_v49, %v1206_v16  ;;  %v1711_v17 = vunpack.i.h.bf16 %v1709_v57  ;;  %v1710_v18 = vunpack.i.l.bf16 %v1709_v57  ;;  %v1104_v19 = vsel %vm2543_vm10, %v1700_v8, %v1701_v7  ;;  %vm2550_vm10 = vmmov %vm2547_vm6 }
 0x45f   :  { %v1530_v6 = vpack.c.bf16 %v1226_v5, %v1050_v59  ;;  %v1211_v33 = vrot.slane %v1104_v19, 4  ;;  %vm2549_vm8 = vcmask 916480  }
 0x460   :  { %v1132_v39 = vsel %vm743_vm0, %v1710_v18, %v1711_v17 }
 0x461   :  { %1532 = vmatprep.subr.msk.bf16.mxu1 %vm2131_vm2, %v1530_v6  ;;  %vm2546_vm2 = vcmask 1039360  }
 0x465   :  { %v2358_v13 = vpop.permute.xlu1 %1718  ;;  %v1714_v47 = vpop.permute.xlu0 %1713 }
 0x466   :  { %v1720_v35 = vunpack.i.l.bf16 %v2358_v13  ;;  %v1715_v56 = vunpack.i.l.bf16 %v1714_v47  ;;  %v1716_v49 = vunpack.i.h.bf16 %v1714_v47  ;;  %v1721_v23 = vunpack.i.h.bf16 %v2358_v13 }
 0x468   :  { %v1087_v38 = vsel %vm2544_vm9, %v1715_v56, %v1680_v50  ;;  %v1067_v40 = vsel %vm2546_vm2, %v1720_v35, %v1685_v44  ;;  %vm2551_vm9 = vmmov %vm2547_vm6 }
 0x469   :  { %v1113_v14 = vrot.slane %v1087_v38, 4  ;;  %v2364_v63 = vpop.permute.xlu1 %1728  ;;  %v2366_v24 = vpop.permute.xlu0 %1723  ;;  %v1190_v55 = vsel %vm2551_vm9, %v1132_v39, %v1182_v41  ;;  %vm2553_vm2 = vmmov %vm2552_vm1 }
 0x46a   :  { %v1730_v25 = vunpack.i.l.bf16 %v2364_v63  ;;  %v1725_v32 = vunpack.i.l.bf16 %v2366_v24  ;;  %vm2558_vm9 = vmmov %vm2552_vm1  ;;  %v1726_v19 = vunpack.i.h.bf16 %v2366_v24 }
 0x46b   :  { %v1121_v10 = vsel %vm2547_vm6, %v1067_v40, %v1113_v14  ;;  %vm2554_vm6 = vmmov 1  }
 0x46c   :  { %v1205_v45 = vrot.slane %v1121_v10, 4  ;;  %v1027_v46 = vsel %vm2548_vm15, %v1730_v25, %v1695_v2  ;;  %v1009_v43 = vsel %vm2549_vm8, %v1725_v32, %v1690_v31  ;;  %v1212_v31 = vsel %vm2553_vm2, %v1206_v16, %v1211_v33 }
 0x46d   :  { %v1057_v48 = vsel %vm2100_vm13, %v1027_v46, 0.0  ;;  %v1041_v50 = vrot.slane %v1009_v43, 4  ;;  %v2377_v44 = vpop.permute.xlu1 %1738  ;;  %v1734_v52 = vpop.permute.xlu0 %1733  ;;  %vm1537_vm13 = vmpackc.low %vm2169_vm11, %vm2554_vm6  ;;  %vm2555_vm15 = vcmask 900096   ;;  %vm2556_vm8 = vcmask 777216  }
 0x46e   :  { %v1225_v53 = vsel %vm2550_vm10, %v1057_v48, %v1205_v45  ;;  %v1740_v54 = vunpack.i.l.bf16 %v2377_v44  ;;  %v1735_v34 = vunpack.i.l.bf16 %v1734_v52  ;;  %v1536_v15 = vpack.c.bf16 %v1190_v55, %v1212_v31  ;;  %vm2557_vm10 = vmmov %vm2552_vm1 }
 0x46f   :  { %v1049_v12 = vsel %vm2552_vm1, %v2307_v27, %v1041_v50  ;;  %vm2559_vm1 = vcmask 908288   ;;  %v1736_v38 = vunpack.i.h.bf16 %v1734_v52  ;;  %v1741_v39 = vunpack.i.h.bf16 %v2377_v44 }
 0x470   :  { %v1533_v58 = vpack.c.bf16 %v1225_v53, %v1049_v12  ;;  %v1151_v60 = vsel %vm2555_vm15, %v1740_v54, %v1705_v3  ;;  %v1103_v62 = vsel %vm2556_vm8, %v1735_v34, %v1700_v8  ;;  %vm2560_vm2 = vmmov %vm2559_vm1 }
 0x471   :  { %v1749_v9 = vpop.permute.xlu1 %1748  ;;  %v2390_v0 = vpop.permute.xlu0 %1743  ;;  %v1209_v2 = vrot.slane %v1103_v62, 4  ;;  %v1181_v16 = vrot.slane %v1151_v60, 4 }
 0x472   :  { %1535 = vmatpush1.bf16.msk.msra.mxu1 %vm2147_vm3, %v1533_v58  ;;  %v1750_v27 = vunpack.i.l.bf16 %v1749_v9  ;;  %v1745_v1 = vunpack.i.l.bf16 %v2390_v0  ;;  %v1751_v4 = vunpack.i.h.bf16 %v1749_v9  ;;  %vm1540_vm3 = vmpackc.low %vm2201_vm14, %vm2554_vm6 }
 0x473   :  { %1538 = vmatprep.subr.msk.bf16.mxu1 %vm1537_vm13, %v1536_v15  ;;  %v1210_v7 = vsel %vm2558_vm9, %v1205_v45, %v1209_v2  ;;  %vm2561_vm13 = vcmask 1039360  }
 0x474   :  { %v1131_v59 = vsel %vm743_vm0, %v1745_v1, %v1710_v18  ;;  %v1095_v11 = vsel %vm2559_vm1, %v1716_v49, %v1750_v27  ;;  %v1096_v47 = vsel %vm2560_vm2, %v1750_v27, %v1751_v4  ;;  %v1731_v18 = vunpack.i.h.bf16 %v2364_v63  ;;  %vm2562_vm15 = vmmov %vm2561_vm13 }
 0x475   :  { %v1769_v5 = vpop.permute.xlu1 %1768  ;;  %v1754_v6 = vpop.permute.xlu0 %1753  ;;  %v1189_v57 = vsel %vm2557_vm10, %v1131_v59, %v1181_v16  ;;  %v1115_v25 = vrot.slane %v1095_v11, 4  ;;  %v1116_v10 = vrot.slane %v1096_v47, 4  ;;  %v1746_v63 = vunpack.i.h.bf16 %v2390_v0  ;;  %vm2563_vm10 = vmmov %vm2556_vm8 }
 0x476   :  { %v1756_v8 = vunpack.i.h.bf16 %v1754_v6  ;;  %v1539_v3 = vpack.c.bf16 %v1189_v57, %v1210_v7  ;;  %v1755_v35 = vunpack.i.l.bf16 %v1754_v6  ;;  %v1771_v56 = vunpack.i.h.bf16 %v1769_v5 }
 0x477   :  { %v1770_v17 = vunpack.i.l.bf16 %v1769_v5  ;;  %vm2565_vm1 = vcmask 900096   ;;  %vm2566_vm2 = vcmask 916480  }
 0x478   :  { %v1077_v21 = vsel %vm2561_vm13, %v1721_v23, %v1755_v35  ;;  %1541 = vmatpush1.bf16.msk.msra.mxu1 %vm1540_vm3, %v1539_v3  ;;  %v1078_v13 = vsel %vm2562_vm15, %v1755_v35, %v1756_v8  ;;  %vm2564_vm3 = vmmov %vm2558_vm9 }
 0x479   :  { %v1774_v14 = vpop.permute.xlu1 %1773  ;;  %v1759_v40 = vpop.permute.xlu0 %1758  ;;  %v1111_v24 = vsel %vm2556_vm8, %v1736_v38, %v1770_v17  ;;  %v1112_v46 = vsel %vm2563_vm10, %v1770_v17, %v1771_v56  ;;  %v1123_v43 = vsel %vm2558_vm9, %v1077_v21, %v1115_v25  ;;  %v1124_v48 = vsel %vm2564_vm3, %v1078_v13, %v1116_v10  ;;  %vm2567_vm13 = vmmov %vm2566_vm2  ;;  %v1229_v38 = vld [vmem:[%s2481_s5] sm:$0xf] }
 0x47a   :  { %v1776_v32 = vunpack.i.h.bf16 %v1774_v14  ;;  %v1775_v33 = vunpack.i.l.bf16 %v1774_v14  ;;  %v1761_v41 = vunpack.i.h.bf16 %v1759_v40  ;;  %v1760_v45 = vunpack.i.l.bf16 %v1759_v40  ;;  %vm2568_vm15 = vmmov %vm2565_vm1 }
 0x47b   :  { %v1215_v31 = vrot.slane %v1112_v46, 4  ;;  %v1207_v60 = vrot.slane %v1123_v43, 4  ;;  %v1208_v0 = vrot.slane %v1124_v48, 4  ;;  %vm2569_vm8 = vmmov %vm2564_vm3  ;;  %vm2570_vm10 = vcmask 785408  }
 0x47c   :  { %v1160_v50 = vsel %vm2565_vm1, %v1775_v33, %v1776_v32  ;;  %v1019_v52 = vsel %vm2566_vm2, %v1726_v19, %v1760_v45  ;;  %v1020_v53 = vsel %vm2567_vm13, %v1760_v45, %v1761_v41  ;;  %v1159_v15 = vsel %vm2568_vm15, %v1741_v39, %v1775_v33  ;;  %vm2571_vm9 = vmmov %vm2570_vm10 }
 0x47d   :  { %v1779_v44 = vpop.permute.xlu1 %1778  ;;  %v1764_v54 = vpop.permute.xlu0 %1763  ;;  %v1043_v55 = vrot.slane %v1019_v52, 4  ;;  %v1044_v12 = vrot.slane %v1020_v53, 4  ;;  %v1184_v2 = vrot.slane %v1160_v50, 4  ;;  %vm2572_vm3 = vcmask 769024   ;;  %vm2573_vm1 = vmmov %vm2569_vm8 }
 0x47e   :  { %v1781_v34 = vunpack.i.h.bf16 %v1779_v44  ;;  %v1780_v58 = vunpack.i.l.bf16 %v1779_v44  ;;  %v1766_v62 = vunpack.i.h.bf16 %v1764_v54  ;;  %v1765_v9 = vunpack.i.l.bf16 %v1764_v54  ;;  %vm2574_vm2 = vmmov %vm2573_vm1 }
 0x47f   :  { %v1051_v1 = vsel %vm2569_vm8, %v2310_v30, %v1043_v55  ;;  %v1052_v30 = vsel %vm2573_vm1, %v2319_v36, %v1044_v12  ;;  %v1213_v29 = vrot.slane %v1111_v24, 4  ;;  %v1183_v35 = vrot.slane %v1159_v15, 4  ;;  %vm1549_vm15 = vmpackc.low %vm2256_vm7, %vm2554_vm6 }
 0x480   :  { %v1142_v27 = vsel %vm743_vm0, %v1780_v58, %v1781_v34  ;;  %v1141_v16 = vsel %vm743_vm0, %v1746_v63, %v1780_v58  ;;  %v1037_v4 = vsel %vm2570_vm10, %v1731_v18, %v1765_v9  ;;  %v1038_v49 = vsel %vm2571_vm9, %v1765_v9, %v1766_v62  ;;  %vm2575_vm0 = vmmov %vm2573_vm1 }
 0x481   :  { %v1174_v59 = vpop.permute.xlu1 %1173  ;;  %v1166_v5 = vpop.permute.xlu0 %1165  ;;  %v1059_v6 = vsel %vm2162_vm5, %v1037_v4, 0.0  ;;  %v1060_v57 = vsel %vm2156_vm4, %v1038_v49, 0.0  ;;  %vm2576_vm13 = vmmov %vm2575_vm0  ;;  %vm2581_vm10 = vnez %v2514_v22  ;;  %vm1236_vm9 = vcmask 293888  }
 0x482   :  { %v1168_v7 = vsel %vm2572_vm3, %v2354_v42, %v1166_v5  ;;  %v1227_v8 = vsel %vm2574_vm2, %v1059_v6, %v1207_v60  ;;  %v1228_v11 = vsel %vm2575_vm0, %v1060_v57, %v1208_v0  ;;  %v1192_v3 = vsel %vm2576_vm13, %v1142_v27, %v1184_v2  ;;  %vm2577_vm5 = vmmov %vm2575_vm0 }
 0x483   :  { %v1198_v23 = vsel %vm2169_vm11, %v1168_v7, 0.0  ;;  %v1545_v47 = vpack.c.bf16 %v1227_v8, %v1051_v1  ;;  %v1542_v51 = vpack.c.bf16 %v1228_v11, %v1052_v30  ;;  %vm2578_vm4 = vmmov %vm2575_vm0 }
 0x484   :  { %1452 = vmatprep.subr.msk.mxu1 %vm2577_vm5, %v1198_v23  ;;  %v1216_v18 = vsel %vm2578_vm4, %v1208_v0, %v1215_v31  ;;  %vm2579_vm8 = vmmov %vm2575_vm0 }
 0x485   :  { %v1162_v56 = vpop.permute.xlu1 %1161  ;;  %v1176_v17 = vpop.permute.xlu0 %1175  ;;  %v1191_v37 = vsel %vm2579_vm8, %v1141_v16, %v1183_v35  ;;  %vm2580_vm11 = vmmov %vm2572_vm3  ;;  %1544 = vmatprep.subr.msk.bf16.mxu0 %vm2581_vm10, %v1542_v51  ;;  %v1548_v19 = vpack.c.bf16 %v1192_v3, %v1216_v18  ;;  %vm2582_vm3 = vnez %v2516_v28 }
 0x486   :  { %v1167_v36 = vsel %vm2580_vm11, %v1162_v56, %v2354_v42  ;;  %1547 = vmatpush1.bf16.msk.msra.mxu0 %vm2582_vm3, %v1545_v47  ;;  %vm2583_vm1 = vmmov %vm2575_vm0 }
 0x487   :  { %v1197_v21 = vsel %vm2201_vm14, %v1167_v36, 0.0  ;;  %v1214_v14 = vsel %vm2583_vm1, %v1207_v60, %v1213_v29  ;;  %vm2584_vm2 = vmmov %vm2580_vm11  ;;  %1550 = vmatprep.subr.msk.bf16.mxu0 %vm1549_vm15, %v1548_v19 }
 0x488   :  { %v1178_v40 = vsel %vm2584_vm2, %v1174_v59, %v1176_v17  ;;  %1453 = vmatpush1.msk.msra.mxu1 %vm2575_vm0, %v1197_v21  ;;  %vm1552_vm13 = vmpackc.low %vm2262_vm12, %vm2554_vm6  ;;  %v1551_v22 = vpack.c.bf16 %v1191_v37, %v1214_v14 }
 0x489   :  { %v1172_v42 = vpop.permute.xlu0 %1171  ;;  %1454 = vmatmul.mubr.msk.f32.vlgmr.msra.gmra.mrb[2].mxu1 %vm1236_vm9, %v1229_v38  ;;  %v1200_v61 = vsel %vm2256_vm7, %v1178_v40, 0.0  ;;  %vm2585_vm14 = vmmov %vm2584_vm2 }
 0x48a   :  { %v1177_v28 = vsel %vm2585_vm14, %v1172_v42, %v1174_v59  ;;  %1553 = vmatpush1.bf16.msk.msra.mxu0 %vm1552_vm13, %v1551_v22  ;;  %vm2586_vm5 = vmmov %vm2575_vm0 }
 0x48b   :  { %1459 = vmatprep.subr.msk.mxu0 %vm2586_vm5, %v1200_v61  ;;  %v1199_v25 = vsel %vm2262_vm12, %v1177_v28, 0.0  ;;  %vm2587_vm4 = vmmov %vm2575_vm0 }
 0x48e   :  { %1460 = vmatpush1.msk.msra.mxu0 %vm2587_vm4, %v1199_v25 }
 0x48f   :  { %1461 = vmatmul.mubr.msk.f32.vlgmr.msra.gmra.mrb[10].mxu0 %vm1236_vm9, %v1229_v38 }
 0x496   :  { %v1234_v13 = vpop.permute.xlu1 %1233 }
 0x55c   :  { %v1318_v32 = vpop.f32.mrb[2].mxu1 }
 0x55d   :  { %v1319_v33 = vadd.f32 %v1318_v32, %v1234_v13  ;;  %v1320_v39 = vpop.f32.mrb[3].mxu1 }
 0x55e   :  { %v1321_v10 = vadd.f32 %v1320_v39, %v1234_v13 }
 0x55f   :  { %v1394_v41 = vmax.f32 %v1319_v33, 0.0 }
 0x560   :  { %v1395_v26 = vmax.f32 %v1321_v10, 0.0 }
 0x562   :  { %v1400_v45 = vcombine.low %v1394_v41, %v1395_v26  ;;  %v1389_v63 = vpop.f32.mrb[10].mxu0 }
 0x563   :  { %v1390_v24 = vadd.f32 %v1389_v63, %v1234_v13  ;;  %v1391_v20 = vpop.f32.mrb[11].mxu0 }
 0x564   :  { %1402 = vst [vmem:[%s2482_s7] sm:$0xff] %v1400_v45  ;;  %v1392_v46 = vadd.f32 %v1391_v20, %v1234_v13 }
 0x565   :  { %v1396_v43 = vmax.f32 %v1390_v24, 0.0 }
 0x566   :  { %v1397_v48 = vmax.f32 %v1392_v46, 0.0 }
 0x568   :  { %v1405_v50 = vcombine.low %v1396_v43, %v1397_v48 }
 0x56a   :  { %1462 = vst [vmem:[%s2482_s7 + $0x8] sm:$0xff] %v1405_v50 }

</bundles_post_ra>
